<compile_context>
chip_gen: v5e
topology: v5e:2x2
jax: 0.10.0
libtpu: 0.0.40
codegen_flags: <defaults>
</compile_context>

<pallas_src>
import functools
import math

import jax
import jax.numpy as jnp
import numpy as np
from jax.experimental import pallas as pl
from jax.experimental.pallas import tpu as pltpu


def encoder_layer_kernel(
    mask_ref, x_ref,
    wqkv_c_ref, wqkv_p_ref, wo_c_ref, wo_p_ref,
    w1c_ref, b1c_ref, w1p_ref, b1p_ref,
    w2c_ref, b2c_ref, w2p_ref, b2p_ref,
    g_attn_ref, be_attn_ref, g_ff_ref, be_ff_ref,
    o_ref,
    oc_scr, op_scr,
    *, n_head, d_qkv,
):
    """One grid step processes a block of `block_b` sequences; everything lives in VMEM."""
    bf16 = jnp.bfloat16
    dq2 = d_qkv // 2
    Hq = n_head * dq2

    x = x_ref[...].astype(jnp.float32)              # (Bb, T, d_model)
    Bb, T, dm = x.shape
    dm2 = dm // 2
    rows = Bb * T
    x2d = x.reshape(rows, dm)

    # ---- fused QKV projection: one (rows, dm/2) @ (dm/2, 3*Hq) matmul per partition ----
    # 1/sqrt(d_qkv) is pre-folded into the Q weight columns host-side; cast to bf16 once.
    qkv_c = jnp.dot(x2d[:, :dm2].astype(bf16), wqkv_c_ref[...],
                    preferred_element_type=jnp.float32).astype(bf16)     # (rows, 3*Hq)
    qkv_p = jnp.dot(x2d[:, dm2:].astype(bf16), wqkv_p_ref[...],
                    preferred_element_type=jnp.float32).astype(bf16)
    qkv_c = qkv_c.reshape(Bb, T, 3 * Hq)            # sublane-only split, free
    qkv_p = qkv_p.reshape(Bb, T, 3 * Hq)

    # additive finite mask (0 keep, -1e30 masked) computed once; broadcasts over heads & queries
    neg = (mask_ref[...] - 1.0) * 1e30              # (Bb, 1, T) f32

    for h in range(n_head):
        c0 = h * dq2
        c1 = c0 + dq2
        # fused per-head operands q=[qc|qp], k=[kc|kp], v=[vc|vp]  ->  K / N = d_qkv
        q = jnp.concatenate([qkv_c[:, :, c0:c1], qkv_p[:, :, c0:c1]], axis=-1)
        k = jnp.concatenate([qkv_c[:, :, Hq + c0:Hq + c1],
                             qkv_p[:, :, Hq + c0:Hq + c1]], axis=-1)
        v = jnp.concatenate([qkv_c[:, :, 2 * Hq + c0:2 * Hq + c1],
                             qkv_p[:, :, 2 * Hq + c0:2 * Hq + c1]], axis=-1)

        # batched over the block_b sequences (no Python batch loop)
        dots = jnp.einsum('bqd,bkd->bqk', q, k,
                          preferred_element_type=jnp.float32) + neg      # (Bb, T, T) f32
        dots = dots - jnp.max(dots, axis=-1, keepdims=True)
        e = jnp.exp(dots)
        inv = pl.reciprocal(jnp.sum(e, axis=-1, keepdims=True), approx=True)
        probs = (e * inv).astype(bf16)

        out_h = jnp.einsum('bqk,bkd->bqd', probs, v,
                           preferred_element_type=jnp.float32).astype(bf16)  # (Bb, T, d_qkv)
        # split fused head output back into c/p halves and store lane-dense into scratch
        oc_scr[:, :, c0:c1] = out_h[:, :, :dq2]
        op_scr[:, :, c0:c1] = out_h[:, :, dq2:]

    # ---- fused output projection (all heads, all sequences in the block) ----
    o_c = oc_scr[...].reshape(rows, Hq)
    o_p = op_scr[...].reshape(rows, Hq)
    out_c = jnp.dot(o_c, wo_c_ref[...], preferred_element_type=jnp.float32)   # (rows, dm2)
    out_p = jnp.dot(o_p, wo_p_ref[...], preferred_element_type=jnp.float32)
    residual = jnp.concatenate([out_c, out_p], axis=-1)                       # (rows, dm)

    def layer_norm(y, g, beta, eps=1e-5):
        mean = jnp.mean(y, axis=-1, keepdims=True)
        var = jnp.mean(jnp.square(y - mean), axis=-1, keepdims=True)
        return (y - mean) * jax.lax.rsqrt(var + eps) * g + beta

    x1 = layer_norm(x2d + residual, g_attn_ref[...], be_attn_ref[...])

    # ---- partitioned feed-forward (bf16 matmuls, f32 accumulation / elementwise) ----
    h_c = jnp.maximum(jnp.dot(x1[:, :dm2].astype(bf16), w1c_ref[...],
                              preferred_element_type=jnp.float32) + b1c_ref[...], 0.0).astype(bf16)
    h_p = jnp.maximum(jnp.dot(x1[:, dm2:].astype(bf16), w1p_ref[...],
                              preferred_element_type=jnp.float32) + b1p_ref[...], 0.0).astype(bf16)
    r_c = jnp.dot(h_c, w2c_ref[...], preferred_element_type=jnp.float32) + b2c_ref[...]
    r_p = jnp.dot(h_p, w2p_ref[...], preferred_element_type=jnp.float32) + b2p_ref[...]

    x2 = layer_norm(x1 + jnp.concatenate([r_c, r_p], axis=-1), g_ff_ref[...], be_ff_ref[...])
    o_ref[...] = x2.reshape(Bb, T, dm).astype(o_ref.dtype)


def pack_params(p, *, n_head, d_qkv):
    """Host-side weight packing (do once, reuse across calls).

    * QKV weights packed per partition to (dm/2, 3*H*dq/2) with lane layout
      [Q_heads | K_heads | V_heads]; the 1/sqrt(d_qkv) scale is folded into the Q columns only.
    * Output-projection weights stacked along the contraction dim -> (H*dq/2, dm/2).
    * nn.Linear weights stored (out, in) are transposed to (in, out).  Matmul operands bf16,
      biases / LayerNorm params stay f32.
    """
    bf16 = jnp.bfloat16
    dq2 = d_qkv // 2
    Hq = n_head * dq2
    dm2 = p["w_qkv_c"].shape[1]
    scale = 1.0 / (d_qkv ** 0.5)
    qscale = jnp.array([scale, 1.0, 1.0], jnp.float32).reshape(1, 1, 3, 1)   # scale Q only

    wqkv_c = jnp.transpose(p["w_qkv_c"] * qscale, (1, 2, 0, 3)).reshape(dm2, 3 * Hq).astype(bf16)
    wqkv_p = jnp.transpose(p["w_qkv_p"] * qscale, (1, 2, 0, 3)).reshape(dm2, 3 * Hq).astype(bf16)
    wo_c = p["w_o_c"].reshape(Hq, dm2).astype(bf16)
    wo_p = p["w_o_p"].reshape(Hq, dm2).astype(bf16)
    w1c, b1c = p["w1_c"].T.astype(bf16), p["b1_c"][None, :].astype(jnp.float32)
    w1p, b1p = p["w1_p"].T.astype(bf16), p["b1_p"][None, :].astype(jnp.float32)
    w2c, b2c = p["w2_c"].T.astype(bf16), p["b2_c"][None, :].astype(jnp.float32)
    w2p, b2p = p["w2_p"].T.astype(bf16), p["b2_p"][None, :].astype(jnp.float32)
    g_attn, be_attn = p["g_attn"][None, :].astype(jnp.float32), p["b_attn"][None, :].astype(jnp.float32)
    g_ff, be_ff = p["g_ff"][None, :].astype(jnp.float32), p["b_ff"][None, :].astype(jnp.float32)

    return (wqkv_c, wqkv_p, wo_c, wo_p,
            w1c, b1c, w1p, b1p, w2c, b2c, w2p, b2p,
            g_attn, be_attn, g_ff, be_ff)


def _pick_block_b(B, T, *, max_rows, min_rows=128, keep_two_steps=True):
    """Pick how many sequences to process per grid step (a divisor of B).

    Aim for a large matmul M (= block_b*T) to amortize per-step overhead at small T.  On 2-TC
    parts (v7x-like) prefer >=2 (even) grid steps so both cores get work; on single-TC parts
    the grid is just a serial loop, so fewer bigger steps win.
    """
    divs = [d for d in range(1, B + 1) if B % d == 0]
    fitting = [d for d in divs if d * T <= max_rows]
    best = max(fitting) if fitting else 1
    if keep_two_steps and B // best < 2:
        cands = [d for d in divs if d < best and B // d >= 2 and d * T >= min_rows]
        if cands:
            even = [d for d in cands if (B // d) % 2 == 0]
            best = max(even) if even else max(cands)
    return best


def partitioned_transformer_encoder_layer(x, mask, p=None, *, n_head, d_qkv,
                                           block_b=None, packed=None):
    B, T, d_model = x.shape
    dq2 = d_qkv // 2
    Hq = n_head * dq2

    if packed is None:
        packed = pack_params(p, n_head=n_head, d_qkv=d_qkv)

    # Adapt memory budget / blocking to the part we are running on.
    try:
        vmem_cap = pltpu.get_tpu_info().vmem_capacity_bytes
    except Exception:
        vmem_cap = 64 * 1024 * 1024            # conservative default (v7x-sized VMEM)
    big_vmem = vmem_cap >= 100 * 1024 * 1024   # v5e / v6e: 128 MiB VMEM, single TC
    vmem_limit = min(int(vmem_cap * 3 // 4), 112 * 1024 * 1024)

    if block_b is None:
        block_b = _pick_block_b(B, T,
                                max_rows=1024 if big_vmem else 512,
                                keep_two_steps=not big_vmem)
    assert B % block_b == 0

    mask_f = mask.astype(jnp.float32)[:, None, :]          # (B, 1, T), 1.0 = keep
    kernel = functools.partial(encoder_layer_kernel, n_head=n_head, d_qkv=d_qkv)
    out_shape = jax.ShapeDtypeStruct((B, T, d_model), x.dtype)

    def run(single_buffer_weights):
        def full_spec(a):
            nd = a.ndim
            idx = lambda i, _nd=nd: (0,) * _nd
            if single_buffer_weights:
                # constant-index weights: no need to double-buffer them (halves their VMEM)
                return pl.BlockSpec(a.shape, idx, pipeline_mode=pl.Buffered(1))
            return pl.BlockSpec(a.shape, idx)

        grid_spec = pltpu.PrefetchScalarGridSpec(
            num_scalar_prefetch=0,
            grid=(B // block_b,),
            in_specs=[pl.BlockSpec((block_b, 1, T), lambda i: (i, 0, 0)),
                      pl.BlockSpec((block_b, T, d_model), lambda i: (i, 0, 0))]
                     + [full_spec(w) for w in packed],
            out_specs=pl.BlockSpec((block_b, T, d_model), lambda i: (i, 0, 0)),
            scratch_shapes=[pltpu.VMEM((block_b, T, Hq), jnp.bfloat16),   # per-head out, c half
                            pltpu.VMEM((block_b, T, Hq), jnp.bfloat16)],  # per-head out, p half
        )
        return pl.pallas_call(
            kernel,
            out_shape=out_shape,
            grid_spec=grid_spec,
            compiler_params=pltpu.CompilerParams(
                dimension_semantics=("parallel",),
                vmem_limit_bytes=vmem_limit,
            ),
        )(mask_f, x, *packed)

    try:
        return run(single_buffer_weights=True)
    except Exception:
        # Fallback if pl.Buffered(1) is not supported by this jax/libtpu combination.
        return run(single_buffer_weights=False)


# ------------------------- pure-JAX reference (mirrors PyTorch forward, f32) -------------------------
def ref_forward(x, mask, p, *, n_head, d_qkv):
    dm = x.shape[-1]
    dm2 = dm // 2
    dq2 = d_qkv // 2
    x_c, x_p = x[..., :dm2], x[..., dm2:]
    qkv_c = jnp.einsum("btf,hfca->bhtca", x_c, p["w_qkv_c"])
    qkv_p = jnp.einsum("btf,hfca->bhtca", x_p, p["w_qkv_p"])
    q = jnp.concatenate([qkv_c[:, :, :, 0], qkv_p[:, :, :, 0]], -1) * (1.0 / d_qkv ** 0.5)
    k = jnp.concatenate([qkv_c[:, :, :, 1], qkv_p[:, :, :, 1]], -1)
    v = jnp.concatenate([qkv_c[:, :, :, 2], qkv_p[:, :, :, 2]], -1)
    dots = jnp.einsum("bhqa,bhka->bhqk", q, k)
    dots = jnp.where(mask[:, None, None, :], dots, -jnp.inf)
    probs = jax.nn.softmax(dots, axis=-1)
    o = jnp.einsum("bhqk,bhka->bhqa", probs, v)
    out_c = jnp.einsum("bhta,haf->btf", o[..., :dq2], p["w_o_c"])
    out_p = jnp.einsum("bhta,haf->btf", o[..., dq2:], p["w_o_p"])
    residual = jnp.concatenate([out_c, out_p], -1)

    def ln(y, g, b, eps=1e-5):
        mean = jnp.mean(y, axis=-1, keepdims=True)
        var = jnp.mean((y - mean) ** 2, axis=-1, keepdims=True)
        return (y - mean) / jnp.sqrt(var + eps) * g + b

    x1 = ln(x + residual, p["g_attn"], p["b_attn"])
    x1_c, x1_p = x1[..., :dm2], x1[..., dm2:]
    h_c = jax.nn.relu(x1_c @ p["w1_c"].T + p["b1_c"])
    h_p = jax.nn.relu(x1_p @ p["w1_p"].T + p["b1_p"])
    r_c = h_c @ p["w2_c"].T + p["b2_c"]
    r_p = h_p @ p["w2_p"].T + p["b2_p"]
    x2 = ln(x1 + jnp.concatenate([r_c, r_p], -1), p["g_ff"], p["b_ff"])
    return x2


if __name__ == "__main__":
    B, T = 2, 8
    d_model, n_head, d_qkv, d_ff = 32, 2, 16, 64
    dm2, dq2, dff2 = d_model // 2, d_qkv // 2, d_ff // 2

    key = jax.random.PRNGKey(0)
    ks = jax.random.split(key, 16)
    bound = math.sqrt(3.0) * 0.02

    p = {
        "w_qkv_c": jax.random.uniform(ks[0], (n_head, dm2, 3, dq2), jnp.float32, -bound, bound),
        "w_qkv_p": jax.random.uniform(ks[1], (n_head, dm2, 3, dq2), jnp.float32, -bound, bound),
        "w_o_c":   jax.random.uniform(ks[2], (n_head, dq2, dm2), jnp.float32, -bound, bound),
        "w_o_p":   jax.random.uniform(ks[3], (n_head, dq2, dm2), jnp.float32, -bound, bound),
        # PyTorch nn.Linear convention: weight is (out_features, in_features)
        "w1_c": jax.random.normal(ks[4], (dff2, dm2), jnp.float32) * 0.05,
        "b1_c": jax.random.normal(ks[5], (dff2,), jnp.float32) * 0.05,
        "w1_p": jax.random.normal(ks[6], (dff2, dm2), jnp.float32) * 0.05,
        "b1_p": jax.random.normal(ks[7], (dff2,), jnp.float32) * 0.05,
        "w2_c": jax.random.normal(ks[8], (dm2, dff2), jnp.float32) * 0.05,
        "b2_c": jax.random.normal(ks[9], (dm2,), jnp.float32) * 0.05,
        "w2_p": jax.random.normal(ks[10], (dm2, dff2), jnp.float32) * 0.05,
        "b2_p": jax.random.normal(ks[11], (dm2,), jnp.float32) * 0.05,
        # nn.LayerNorm default init is ones / zeros
        "g_attn": jnp.ones((d_model,), jnp.float32),
        "b_attn": jnp.zeros((d_model,), jnp.float32),
        "g_ff":   jnp.ones((d_model,), jnp.float32),
        "b_ff":   jnp.zeros((d_model,), jnp.float32),
    }

    x = jax.random.normal(ks[12], (B, T, d_model), jnp.float32)
    lengths = jnp.array([T, T - 2], dtype=jnp.int32)
    mask = jnp.arange(T)[None, :] < lengths[:, None]        # (B, T) bool

    # Pack weights once (hoisted out of the per-call path), then run the kernel.
    packed = pack_params(p, n_head=n_head, d_qkv=d_qkv)
    out = partitioned_transformer_encoder_layer(x, mask, n_head=n_head, d_qkv=d_qkv,
                                                packed=packed)
    out = jax.block_until_ready(out)

    ref = jax.block_until_ready(ref_forward(x, mask, p, n_head=n_head, d_qkv=d_qkv))

    assert out.shape == (B, T, d_model)
    assert bool(jnp.all(jnp.isfinite(out)))
    # bf16 matmul inputs (f32 accumulation) => allow slightly looser absolute tolerance.
    np.testing.assert_allclose(np.asarray(out), np.asarray(ref), rtol=1e-2, atol=5e-3)
    print("KERNEL_OK")
</pallas_src>

<mosaic_0001>
module attributes {stable_mosaic.version = 11 : i64} {
  func.func @encoder_layer_kernel(%arg0: i32, %arg1: memref<2x1x8xf32, #tpu.memory_space<vmem>>, %arg2: memref<2x8x32xf32, #tpu.memory_space<vmem>>, %arg3: memref<16x48xbf16, #tpu.memory_space<vmem>>, %arg4: memref<16x48xbf16, #tpu.memory_space<vmem>>, %arg5: memref<16x16xbf16, #tpu.memory_space<vmem>>, %arg6: memref<16x16xbf16, #tpu.memory_space<vmem>>, %arg7: memref<16x32xbf16, #tpu.memory_space<vmem>>, %arg8: memref<1x32xf32, #tpu.memory_space<vmem>>, %arg9: memref<16x32xbf16, #tpu.memory_space<vmem>>, %arg10: memref<1x32xf32, #tpu.memory_space<vmem>>, %arg11: memref<32x16xbf16, #tpu.memory_space<vmem>>, %arg12: memref<1x16xf32, #tpu.memory_space<vmem>>, %arg13: memref<32x16xbf16, #tpu.memory_space<vmem>>, %arg14: memref<1x16xf32, #tpu.memory_space<vmem>>, %arg15: memref<1x32xf32, #tpu.memory_space<vmem>>, %arg16: memref<1x32xf32, #tpu.memory_space<vmem>>, %arg17: memref<1x32xf32, #tpu.memory_space<vmem>>, %arg18: memref<1x32xf32, #tpu.memory_space<vmem>>, %arg19: memref<2x8x32xf32, #tpu.memory_space<vmem>>, %arg20: memref<2x8x16xbf16, #tpu.memory_space<vmem>>, %arg21: memref<2x8x16xbf16, #tpu.memory_space<vmem>>) attributes {dimension_semantics = [#tpu.dimension_semantics<parallel>], iteration_bounds = array<i64: 1>, scalar_prefetch = 0 : i64, scratch_operands = 2 : i64, tpu.core_type = #tpu.core_type<tc>, window_params = [{transform_indices = @transform_0, window_bounds = array<i64: 2, 1, 8>}, {transform_indices = @transform_1, window_bounds = array<i64: 2, 8, 32>}, {pipeline_mode = #tpu.pipeline_mode<synchronous>, transform_indices = @transform_2, window_bounds = array<i64: 16, 48>}, {pipeline_mode = #tpu.pipeline_mode<synchronous>, transform_indices = @transform_3, window_bounds = array<i64: 16, 48>}, {pipeline_mode = #tpu.pipeline_mode<synchronous>, transform_indices = @transform_4, window_bounds = array<i64: 16, 16>}, {pipeline_mode = #tpu.pipeline_mode<synchronous>, transform_indices = @transform_5, window_bounds = array<i64: 16, 16>}, {pipeline_mode = #tpu.pipeline_mode<synchronous>, transform_indices = @transform_6, window_bounds = array<i64: 16, 32>}, {pipeline_mode = #tpu.pipeline_mode<synchronous>, transform_indices = @transform_7, window_bounds = array<i64: 1, 32>}, {pipeline_mode = #tpu.pipeline_mode<synchronous>, transform_indices = @transform_8, window_bounds = array<i64: 16, 32>}, {pipeline_mode = #tpu.pipeline_mode<synchronous>, transform_indices = @transform_9, window_bounds = array<i64: 1, 32>}, {pipeline_mode = #tpu.pipeline_mode<synchronous>, transform_indices = @transform_10, window_bounds = array<i64: 32, 16>}, {pipeline_mode = #tpu.pipeline_mode<synchronous>, transform_indices = @transform_11, window_bounds = array<i64: 1, 16>}, {pipeline_mode = #tpu.pipeline_mode<synchronous>, transform_indices = @transform_12, window_bounds = array<i64: 32, 16>}, {pipeline_mode = #tpu.pipeline_mode<synchronous>, transform_indices = @transform_13, window_bounds = array<i64: 1, 16>}, {pipeline_mode = #tpu.pipeline_mode<synchronous>, transform_indices = @transform_14, window_bounds = array<i64: 1, 32>}, {pipeline_mode = #tpu.pipeline_mode<synchronous>, transform_indices = @transform_15, window_bounds = array<i64: 1, 32>}, {pipeline_mode = #tpu.pipeline_mode<synchronous>, transform_indices = @transform_16, window_bounds = array<i64: 1, 32>}, {pipeline_mode = #tpu.pipeline_mode<synchronous>, transform_indices = @transform_17, window_bounds = array<i64: 1, 32>}, {transform_indices = @transform_18, window_bounds = array<i64: 2, 8, 32>}]} {
    %c0 = arith.constant 0 : index
    %c0_0 = arith.constant 0 : index
    %c0_1 = arith.constant 0 : index
    %0 = vector.load %arg2[%c0, %c0_0, %c0_1] : memref<2x8x32xf32, #tpu.memory_space<vmem>>, vector<2x8x32xf32>
    %1 = vector.shape_cast %0 : vector<2x8x32xf32> to vector<16x32xf32>
    %2 = vector.extract_strided_slice %1 {offsets = [0, 0], sizes = [16, 16], strides = [1, 1]} : vector<16x32xf32> to vector<16x16xf32>
    %3 = arith.truncf %2 : vector<16x16xf32> to vector<16x16xbf16>
    %c0_2 = arith.constant 0 : index
    %c0_3 = arith.constant 0 : index
    %4 = vector.load %arg3[%c0_2, %c0_3] : memref<16x48xbf16, #tpu.memory_space<vmem>>, vector<16x48xbf16>
    %cst = arith.constant dense<0.000000e+00> : vector<16x48xf32>
    %5 = tpu.matmul %3, %4, %cst {dimension_numbers = #tpu.dot_dimension_numbers<[1], [0], [0], [1], [0, 0, 1, 1], [], []>} : vector<16x16xbf16>, vector<16x48xbf16>, vector<16x48xf32> -> vector<16x48xf32>
    %6 = arith.truncf %5 : vector<16x48xf32> to vector<16x48xbf16>
    %7 = vector.extract_strided_slice %1 {offsets = [0, 16], sizes = [16, 16], strides = [1, 1]} : vector<16x32xf32> to vector<16x16xf32>
    %8 = arith.truncf %7 : vector<16x16xf32> to vector<16x16xbf16>
    %c0_4 = arith.constant 0 : index
    %c0_5 = arith.constant 0 : index
    %9 = vector.load %arg4[%c0_4, %c0_5] : memref<16x48xbf16, #tpu.memory_space<vmem>>, vector<16x48xbf16>
    %cst_6 = arith.constant dense<0.000000e+00> : vector<16x48xf32>
    %10 = tpu.matmul %8, %9, %cst_6 {dimension_numbers = #tpu.dot_dimension_numbers<[1], [0], [0], [1], [0, 0, 1, 1], [], []>} : vector<16x16xbf16>, vector<16x48xbf16>, vector<16x48xf32> -> vector<16x48xf32>
    %11 = arith.truncf %10 : vector<16x48xf32> to vector<16x48xbf16>
    %12 = vector.shape_cast %6 : vector<16x48xbf16> to vector<2x8x48xbf16>
    %13 = vector.shape_cast %11 : vector<16x48xbf16> to vector<2x8x48xbf16>
    %c0_7 = arith.constant 0 : index
    %c0_8 = arith.constant 0 : index
    %c0_9 = arith.constant 0 : index
    %14 = vector.load %arg1[%c0_7, %c0_8, %c0_9] : memref<2x1x8xf32, #tpu.memory_space<vmem>>, vector<2x1x8xf32>
    %cst_10 = arith.constant 1.000000e+00 : f32
    %15 = vector.broadcast %cst_10 : f32 to vector<2x1x8xf32>
    %16 = arith.subf %14, %15 : vector<2x1x8xf32>
    %cst_11 = arith.constant 1.000000e+30 : f32
    %17 = vector.broadcast %cst_11 : f32 to vector<2x1x8xf32>
    %18 = arith.mulf %16, %17 : vector<2x1x8xf32>
    %19 = vector.extract_strided_slice %12 {offsets = [0, 0, 0], sizes = [2, 8, 8], strides = [1, 1, 1]} : vector<2x8x48xbf16> to vector<2x8x8xbf16>
    %20 = vector.extract_strided_slice %13 {offsets = [0, 0, 0], sizes = [2, 8, 8], strides = [1, 1, 1]} : vector<2x8x48xbf16> to vector<2x8x8xbf16>
    %21 = tpu.concatenate %19, %20 in 2 : vector<2x8x8xbf16>, vector<2x8x8xbf16> -> vector<2x8x16xbf16>
    %22 = vector.extract_strided_slice %12 {offsets = [0, 0, 16], sizes = [2, 8, 8], strides = [1, 1, 1]} : vector<2x8x48xbf16> to vector<2x8x8xbf16>
    %23 = vector.extract_strided_slice %13 {offsets = [0, 0, 16], sizes = [2, 8, 8], strides = [1, 1, 1]} : vector<2x8x48xbf16> to vector<2x8x8xbf16>
    %24 = tpu.concatenate %22, %23 in 2 : vector<2x8x8xbf16>, vector<2x8x8xbf16> -> vector<2x8x16xbf16>
    %25 = vector.extract_strided_slice %12 {offsets = [0, 0, 32], sizes = [2, 8, 8], strides = [1, 1, 1]} : vector<2x8x48xbf16> to vector<2x8x8xbf16>
    %26 = vector.extract_strided_slice %13 {offsets = [0, 0, 32], sizes = [2, 8, 8], strides = [1, 1, 1]} : vector<2x8x48xbf16> to vector<2x8x8xbf16>
    %27 = tpu.concatenate %25, %26 in 2 : vector<2x8x8xbf16>, vector<2x8x8xbf16> -> vector<2x8x16xbf16>
    "tpu.trace_start"() <{level = 10 : i32, message = "bqd,bkd->bqk"}> : () -> ()
    %cst_12 = arith.constant dense<0.000000e+00> : vector<2x8x8xf32>
    %28 = tpu.matmul %21, %24, %cst_12 {dimension_numbers = #tpu.dot_dimension_numbers<[2], [2], [1], [1], [0, 0, 0, 1, 1, 1], [0], [0]>} : vector<2x8x16xbf16>, vector<2x8x16xbf16>, vector<2x8x8xf32> -> vector<2x8x8xf32>
    "tpu.trace_stop"() : () -> ()
    %29 = vector.broadcast %18 : vector<2x1x8xf32> to vector<2x8x8xf32>
    %30 = arith.addf %28, %29 : vector<2x8x8xf32>
    %cst_13 = arith.constant dense<0xFF800000> : vector<2x8xf32>
    %31 = vector.multi_reduction <maximumf>, %30, %cst_13 [2] : vector<2x8x8xf32> to vector<2x8xf32>
    %32 = vector.shape_cast %31 : vector<2x8xf32> to vector<2x8x1xf32>
    %33 = vector.broadcast %32 : vector<2x8x1xf32> to vector<2x8x8xf32>
    %34 = arith.subf %30, %33 : vector<2x8x8xf32>
    %35 = math.exp %34 : vector<2x8x8xf32>
    %cst_14 = arith.constant dense<0.000000e+00> : vector<2x8xf32>
    %36 = vector.multi_reduction <add>, %35, %cst_14 [2] : vector<2x8x8xf32> to vector<2x8xf32>
    %37 = vector.shape_cast %36 : vector<2x8xf32> to vector<2x8x1xf32>
    %38 = tpu.reciprocal %37 {approx = true} : vector<2x8x1xf32> -> vector<2x8x1xf32>
    %39 = vector.broadcast %38 : vector<2x8x1xf32> to vector<2x8x8xf32>
    %40 = arith.mulf %35, %39 : vector<2x8x8xf32>
    %41 = arith.truncf %40 : vector<2x8x8xf32> to vector<2x8x8xbf16>
    "tpu.trace_start"() <{level = 10 : i32, message = "bqk,bkd->bqd"}> : () -> ()
    %cst_15 = arith.constant dense<0.000000e+00> : vector<2x8x16xf32>
    %42 = tpu.matmul %41, %27, %cst_15 {dimension_numbers = #tpu.dot_dimension_numbers<[2], [1], [1], [2], [0, 0, 0, 1, 1, 2], [0], [0]>} : vector<2x8x8xbf16>, vector<2x8x16xbf16>, vector<2x8x16xf32> -> vector<2x8x16xf32>
    "tpu.trace_stop"() : () -> ()
    %43 = arith.truncf %42 : vector<2x8x16xf32> to vector<2x8x16xbf16>
    %44 = vector.extract_strided_slice %43 {offsets = [0, 0, 0], sizes = [2, 8, 8], strides = [1, 1, 1]} : vector<2x8x16xbf16> to vector<2x8x8xbf16>
    %c0_16 = arith.constant 0 : index
    %c0_17 = arith.constant 0 : index
    %c0_18 = arith.constant 0 : index
    %45 = vector.load %arg20[%c0_16, %c0_17, %c0_18] : memref<2x8x16xbf16, #tpu.memory_space<vmem>>, vector<2x8x8xbf16>
    tpu.vector_store %arg20[%c0_16, %c0_17, %c0_18], %44 {strides = array<i32>} : memref<2x8x16xbf16, #tpu.memory_space<vmem>>, vector<2x8x8xbf16>,
    %46 = vector.extract_strided_slice %43 {offsets = [0, 0, 8], sizes = [2, 8, 8], strides = [1, 1, 1]} : vector<2x8x16xbf16> to vector<2x8x8xbf16>
    %c0_19 = arith.constant 0 : index
    %c0_20 = arith.constant 0 : index
    %c0_21 = arith.constant 0 : index
    %47 = vector.load %arg21[%c0_19, %c0_20, %c0_21] : memref<2x8x16xbf16, #tpu.memory_space<vmem>>, vector<2x8x8xbf16>
    tpu.vector_store %arg21[%c0_19, %c0_20, %c0_21], %46 {strides = array<i32>} : memref<2x8x16xbf16, #tpu.memory_space<vmem>>, vector<2x8x8xbf16>,
    %48 = vector.extract_strided_slice %12 {offsets = [0, 0, 8], sizes = [2, 8, 8], strides = [1, 1, 1]} : vector<2x8x48xbf16> to vector<2x8x8xbf16>
    %49 = vector.extract_strided_slice %13 {offsets = [0, 0, 8], sizes = [2, 8, 8], strides = [1, 1, 1]} : vector<2x8x48xbf16> to vector<2x8x8xbf16>
    %50 = tpu.concatenate %48, %49 in 2 : vector<2x8x8xbf16>, vector<2x8x8xbf16> -> vector<2x8x16xbf16>
    %51 = vector.extract_strided_slice %12 {offsets = [0, 0, 24], sizes = [2, 8, 8], strides = [1, 1, 1]} : vector<2x8x48xbf16> to vector<2x8x8xbf16>
    %52 = vector.extract_strided_slice %13 {offsets = [0, 0, 24], sizes = [2, 8, 8], strides = [1, 1, 1]} : vector<2x8x48xbf16> to vector<2x8x8xbf16>
    %53 = tpu.concatenate %51, %52 in 2 : vector<2x8x8xbf16>, vector<2x8x8xbf16> -> vector<2x8x16xbf16>
    %54 = vector.extract_strided_slice %12 {offsets = [0, 0, 40], sizes = [2, 8, 8], strides = [1, 1, 1]} : vector<2x8x48xbf16> to vector<2x8x8xbf16>
    %55 = vector.extract_strided_slice %13 {offsets = [0, 0, 40], sizes = [2, 8, 8], strides = [1, 1, 1]} : vector<2x8x48xbf16> to vector<2x8x8xbf16>
    %56 = tpu.concatenate %54, %55 in 2 : vector<2x8x8xbf16>, vector<2x8x8xbf16> -> vector<2x8x16xbf16>
    "tpu.trace_start"() <{level = 10 : i32, message = "bqd,bkd->bqk"}> : () -> ()
    %cst_22 = arith.constant dense<0.000000e+00> : vector<2x8x8xf32>
    %57 = tpu.matmul %50, %53, %cst_22 {dimension_numbers = #tpu.dot_dimension_numbers<[2], [2], [1], [1], [0, 0, 0, 1, 1, 1], [0], [0]>} : vector<2x8x16xbf16>, vector<2x8x16xbf16>, vector<2x8x8xf32> -> vector<2x8x8xf32>
    "tpu.trace_stop"() : () -> ()
    %58 = vector.broadcast %18 : vector<2x1x8xf32> to vector<2x8x8xf32>
    %59 = arith.addf %57, %58 : vector<2x8x8xf32>
    %cst_23 = arith.constant dense<0xFF800000> : vector<2x8xf32>
    %60 = vector.multi_reduction <maximumf>, %59, %cst_23 [2] : vector<2x8x8xf32> to vector<2x8xf32>
    %61 = vector.shape_cast %60 : vector<2x8xf32> to vector<2x8x1xf32>
    %62 = vector.broadcast %61 : vector<2x8x1xf32> to vector<2x8x8xf32>
    %63 = arith.subf %59, %62 : vector<2x8x8xf32>
    %64 = math.exp %63 : vector<2x8x8xf32>
    %cst_24 = arith.constant dense<0.000000e+00> : vector<2x8xf32>
    %65 = vector.multi_reduction <add>, %64, %cst_24 [2] : vector<2x8x8xf32> to vector<2x8xf32>
    %66 = vector.shape_cast %65 : vector<2x8xf32> to vector<2x8x1xf32>
    %67 = tpu.reciprocal %66 {approx = true} : vector<2x8x1xf32> -> vector<2x8x1xf32>
    %68 = vector.broadcast %67 : vector<2x8x1xf32> to vector<2x8x8xf32>
    %69 = arith.mulf %64, %68 : vector<2x8x8xf32>
    %70 = arith.truncf %69 : vector<2x8x8xf32> to vector<2x8x8xbf16>
    "tpu.trace_start"() <{level = 10 : i32, message = "bqk,bkd->bqd"}> : () -> ()
    %cst_25 = arith.constant dense<0.000000e+00> : vector<2x8x16xf32>
    %71 = tpu.matmul %70, %56, %cst_25 {dimension_numbers = #tpu.dot_dimension_numbers<[2], [1], [1], [2], [0, 0, 0, 1, 1, 2], [0], [0]>} : vector<2x8x8xbf16>, vector<2x8x16xbf16>, vector<2x8x16xf32> -> vector<2x8x16xf32>
    "tpu.trace_stop"() : () -> ()
    %72 = arith.truncf %71 : vector<2x8x16xf32> to vector<2x8x16xbf16>
    %73 = vector.extract_strided_slice %72 {offsets = [0, 0, 0], sizes = [2, 8, 8], strides = [1, 1, 1]} : vector<2x8x16xbf16> to vector<2x8x8xbf16>
    %c0_26 = arith.constant 0 : index
    %c0_27 = arith.constant 0 : index
    %c8 = arith.constant 8 : index
    %74 = vector.load %arg20[%c0_26, %c0_27, %c8] : memref<2x8x16xbf16, #tpu.memory_space<vmem>>, vector<2x8x8xbf16>
    tpu.vector_store %arg20[%c0_26, %c0_27, %c8], %73 {strides = array<i32>} : memref<2x8x16xbf16, #tpu.memory_space<vmem>>, vector<2x8x8xbf16>,
    %75 = vector.extract_strided_slice %72 {offsets = [0, 0, 8], sizes = [2, 8, 8], strides = [1, 1, 1]} : vector<2x8x16xbf16> to vector<2x8x8xbf16>
    %c0_28 = arith.constant 0 : index
    %c0_29 = arith.constant 0 : index
    %c8_30 = arith.constant 8 : index
    %76 = vector.load %arg21[%c0_28, %c0_29, %c8_30] : memref<2x8x16xbf16, #tpu.memory_space<vmem>>, vector<2x8x8xbf16>
    tpu.vector_store %arg21[%c0_28, %c0_29, %c8_30], %75 {strides = array<i32>} : memref<2x8x16xbf16, #tpu.memory_space<vmem>>, vector<2x8x8xbf16>,
    %c0_31 = arith.constant 0 : index
    %c0_32 = arith.constant 0 : index
    %c0_33 = arith.constant 0 : index
    %77 = vector.load %arg20[%c0_31, %c0_32, %c0_33] : memref<2x8x16xbf16, #tpu.memory_space<vmem>>, vector<2x8x16xbf16>
    %78 = vector.shape_cast %77 : vector<2x8x16xbf16> to vector<16x16xbf16>
    %c0_34 = arith.constant 0 : index
    %c0_35 = arith.constant 0 : index
    %c0_36 = arith.constant 0 : index
    %79 = vector.load %arg21[%c0_34, %c0_35, %c0_36] : memref<2x8x16xbf16, #tpu.memory_space<vmem>>, vector<2x8x16xbf16>
    %80 = vector.shape_cast %79 : vector<2x8x16xbf16> to vector<16x16xbf16>
    %c0_37 = arith.constant 0 : index
    %c0_38 = arith.constant 0 : index
    %81 = vector.load %arg5[%c0_37, %c0_38] : memref<16x16xbf16, #tpu.memory_space<vmem>>, vector<16x16xbf16>
    %cst_39 = arith.constant dense<0.000000e+00> : vector<16x16xf32>
    %82 = tpu.matmul %78, %81, %cst_39 {dimension_numbers = #tpu.dot_dimension_numbers<[1], [0], [0], [1], [0, 0, 1, 1], [], []>} : vector<16x16xbf16>, vector<16x16xbf16>, vector<16x16xf32> -> vector<16x16xf32>
    %c0_40 = arith.constant 0 : index
    %c0_41 = arith.constant 0 : index
    %83 = vector.load %arg6[%c0_40, %c0_41] : memref<16x16xbf16, #tpu.memory_space<vmem>>, vector<16x16xbf16>
    %cst_42 = arith.constant dense<0.000000e+00> : vector<16x16xf32>
    %84 = tpu.matmul %80, %83, %cst_42 {dimension_numbers = #tpu.dot_dimension_numbers<[1], [0], [0], [1], [0, 0, 1, 1], [], []>} : vector<16x16xbf16>, vector<16x16xbf16>, vector<16x16xf32> -> vector<16x16xf32>
    %85 = tpu.concatenate %82, %84 in 1 : vector<16x16xf32>, vector<16x16xf32> -> vector<16x32xf32>
    %86 = arith.addf %1, %85 : vector<16x32xf32>
    %c0_43 = arith.constant 0 : index
    %c0_44 = arith.constant 0 : index
    %87 = vector.load %arg15[%c0_43, %c0_44] : memref<1x32xf32, #tpu.memory_space<vmem>>, vector<1x32xf32>
    %c0_45 = arith.constant 0 : index
    %c0_46 = arith.constant 0 : index
    %88 = vector.load %arg16[%c0_45, %c0_46] : memref<1x32xf32, #tpu.memory_space<vmem>>, vector<1x32xf32>
    %cst_47 = arith.constant dense<0.000000e+00> : vector<16xf32>
    %89 = vector.multi_reduction <add>, %86, %cst_47 [1] : vector<16x32xf32> to vector<16xf32>
    %90 = vector.shape_cast %89 : vector<16xf32> to vector<16x1xf32>
    %cst_48 = arith.constant 3.200000e+01 : f32
    %91 = vector.broadcast %cst_48 : f32 to vector<16x1xf32>
    %92 = arith.divf %90, %91 : vector<16x1xf32>
    %93 = vector.broadcast %92 : vector<16x1xf32> to vector<16x32xf32>
    %94 = arith.subf %86, %93 : vector<16x32xf32>
    %95 = arith.mulf %94, %94 : vector<16x32xf32>
    %cst_49 = arith.constant dense<0.000000e+00> : vector<16xf32>
    %96 = vector.multi_reduction <add>, %95, %cst_49 [1] : vector<16x32xf32> to vector<16xf32>
    %97 = vector.shape_cast %96 : vector<16xf32> to vector<16x1xf32>
    %cst_50 = arith.constant 3.200000e+01 : f32
    %98 = vector.broadcast %cst_50 : f32 to vector<16x1xf32>
    %99 = arith.divf %97, %98 : vector<16x1xf32>
    %100 = vector.broadcast %92 : vector<16x1xf32> to vector<16x32xf32>
    %101 = arith.subf %86, %100 : vector<16x32xf32>
    %cst_51 = arith.constant 9.99999974E-6 : f32
    %102 = vector.broadcast %cst_51 : f32 to vector<16x1xf32>
    %103 = arith.addf %99, %102 : vector<16x1xf32>
    %104 = math.rsqrt %103 : vector<16x1xf32>
    %105 = vector.broadcast %104 : vector<16x1xf32> to vector<16x32xf32>
    %106 = arith.mulf %101, %105 : vector<16x32xf32>
    %107 = vector.broadcast %87 : vector<1x32xf32> to vector<16x32xf32>
    %108 = arith.mulf %106, %107 : vector<16x32xf32>
    %109 = vector.broadcast %88 : vector<1x32xf32> to vector<16x32xf32>
    %110 = arith.addf %108, %109 : vector<16x32xf32>
    %111 = vector.extract_strided_slice %110 {offsets = [0, 0], sizes = [16, 16], strides = [1, 1]} : vector<16x32xf32> to vector<16x16xf32>
    %112 = arith.truncf %111 : vector<16x16xf32> to vector<16x16xbf16>
    %c0_52 = arith.constant 0 : index
    %c0_53 = arith.constant 0 : index
    %113 = vector.load %arg7[%c0_52, %c0_53] : memref<16x32xbf16, #tpu.memory_space<vmem>>, vector<16x32xbf16>
    %cst_54 = arith.constant dense<0.000000e+00> : vector<16x32xf32>
    %114 = tpu.matmul %112, %113, %cst_54 {dimension_numbers = #tpu.dot_dimension_numbers<[1], [0], [0], [1], [0, 0, 1, 1], [], []>} : vector<16x16xbf16>, vector<16x32xbf16>, vector<16x32xf32> -> vector<16x32xf32>
    %c0_55 = arith.constant 0 : index
    %c0_56 = arith.constant 0 : index
    %115 = vector.load %arg8[%c0_55, %c0_56] : memref<1x32xf32, #tpu.memory_space<vmem>>, vector<1x32xf32>
    %116 = vector.broadcast %115 : vector<1x32xf32> to vector<16x32xf32>
    %117 = arith.addf %114, %116 : vector<16x32xf32>
    %cst_57 = arith.constant 0.000000e+00 : f32
    %118 = vector.broadcast %cst_57 : f32 to vector<16x32xf32>
    %119 = arith.maximumf %117, %118 : vector<16x32xf32>
    %120 = arith.truncf %119 : vector<16x32xf32> to vector<16x32xbf16>
    %121 = vector.extract_strided_slice %110 {offsets = [0, 16], sizes = [16, 16], strides = [1, 1]} : vector<16x32xf32> to vector<16x16xf32>
    %122 = arith.truncf %121 : vector<16x16xf32> to vector<16x16xbf16>
    %c0_58 = arith.constant 0 : index
    %c0_59 = arith.constant 0 : index
    %123 = vector.load %arg9[%c0_58, %c0_59] : memref<16x32xbf16, #tpu.memory_space<vmem>>, vector<16x32xbf16>
    %cst_60 = arith.constant dense<0.000000e+00> : vector<16x32xf32>
    %124 = tpu.matmul %122, %123, %cst_60 {dimension_numbers = #tpu.dot_dimension_numbers<[1], [0], [0], [1], [0, 0, 1, 1], [], []>} : vector<16x16xbf16>, vector<16x32xbf16>, vector<16x32xf32> -> vector<16x32xf32>
    %c0_61 = arith.constant 0 : index
    %c0_62 = arith.constant 0 : index
    %125 = vector.load %arg10[%c0_61, %c0_62] : memref<1x32xf32, #tpu.memory_space<vmem>>, vector<1x32xf32>
    %126 = vector.broadcast %125 : vector<1x32xf32> to vector<16x32xf32>
    %127 = arith.addf %124, %126 : vector<16x32xf32>
    %cst_63 = arith.constant 0.000000e+00 : f32
    %128 = vector.broadcast %cst_63 : f32 to vector<16x32xf32>
    %129 = arith.maximumf %127, %128 : vector<16x32xf32>
    %130 = arith.truncf %129 : vector<16x32xf32> to vector<16x32xbf16>
    %c0_64 = arith.constant 0 : index
    %c0_65 = arith.constant 0 : index
    %131 = vector.load %arg11[%c0_64, %c0_65] : memref<32x16xbf16, #tpu.memory_space<vmem>>, vector<32x16xbf16>
    %cst_66 = arith.constant dense<0.000000e+00> : vector<16x16xf32>
    %132 = tpu.matmul %120, %131, %cst_66 {dimension_numbers = #tpu.dot_dimension_numbers<[1], [0], [0], [1], [0, 0, 1, 1], [], []>} : vector<16x32xbf16>, vector<32x16xbf16>, vector<16x16xf32> -> vector<16x16xf32>
    %c0_67 = arith.constant 0 : index
    %c0_68 = arith.constant 0 : index
    %133 = vector.load %arg12[%c0_67, %c0_68] : memref<1x16xf32, #tpu.memory_space<vmem>>, vector<1x16xf32>
    %134 = vector.broadcast %133 : vector<1x16xf32> to vector<16x16xf32>
    %135 = arith.addf %132, %134 : vector<16x16xf32>
    %c0_69 = arith.constant 0 : index
    %c0_70 = arith.constant 0 : index
    %136 = vector.load %arg13[%c0_69, %c0_70] : memref<32x16xbf16, #tpu.memory_space<vmem>>, vector<32x16xbf16>
    %cst_71 = arith.constant dense<0.000000e+00> : vector<16x16xf32>
    %137 = tpu.matmul %130, %136, %cst_71 {dimension_numbers = #tpu.dot_dimension_numbers<[1], [0], [0], [1], [0, 0, 1, 1], [], []>} : vector<16x32xbf16>, vector<32x16xbf16>, vector<16x16xf32> -> vector<16x16xf32>
    %c0_72 = arith.constant 0 : index
    %c0_73 = arith.constant 0 : index
    %138 = vector.load %arg14[%c0_72, %c0_73] : memref<1x16xf32, #tpu.memory_space<vmem>>, vector<1x16xf32>
    %139 = vector.broadcast %138 : vector<1x16xf32> to vector<16x16xf32>
    %140 = arith.addf %137, %139 : vector<16x16xf32>
    %141 = tpu.concatenate %135, %140 in 1 : vector<16x16xf32>, vector<16x16xf32> -> vector<16x32xf32>
    %142 = arith.addf %110, %141 : vector<16x32xf32>
    %c0_74 = arith.constant 0 : index
    %c0_75 = arith.constant 0 : index
    %143 = vector.load %arg17[%c0_74, %c0_75] : memref<1x32xf32, #tpu.memory_space<vmem>>, vector<1x32xf32>
    %c0_76 = arith.constant 0 : index
    %c0_77 = arith.constant 0 : index
    %144 = vector.load %arg18[%c0_76, %c0_77] : memref<1x32xf32, #tpu.memory_space<vmem>>, vector<1x32xf32>
    %cst_78 = arith.constant dense<0.000000e+00> : vector<16xf32>
    %145 = vector.multi_reduction <add>, %142, %cst_78 [1] : vector<16x32xf32> to vector<16xf32>
    %146 = vector.shape_cast %145 : vector<16xf32> to vector<16x1xf32>
    %cst_79 = arith.constant 3.200000e+01 : f32
    %147 = vector.broadcast %cst_79 : f32 to vector<16x1xf32>
    %148 = arith.divf %146, %147 : vector<16x1xf32>
    %149 = vector.broadcast %148 : vector<16x1xf32> to vector<16x32xf32>
    %150 = arith.subf %142, %149 : vector<16x32xf32>
    %151 = arith.mulf %150, %150 : vector<16x32xf32>
    %cst_80 = arith.constant dense<0.000000e+00> : vector<16xf32>
    %152 = vector.multi_reduction <add>, %151, %cst_80 [1] : vector<16x32xf32> to vector<16xf32>
    %153 = vector.shape_cast %152 : vector<16xf32> to vector<16x1xf32>
    %cst_81 = arith.constant 3.200000e+01 : f32
    %154 = vector.broadcast %cst_81 : f32 to vector<16x1xf32>
    %155 = arith.divf %153, %154 : vector<16x1xf32>
    %156 = vector.broadcast %148 : vector<16x1xf32> to vector<16x32xf32>
    %157 = arith.subf %142, %156 : vector<16x32xf32>
    %cst_82 = arith.constant 9.99999974E-6 : f32
    %158 = vector.broadcast %cst_82 : f32 to vector<16x1xf32>
    %159 = arith.addf %155, %158 : vector<16x1xf32>
    %160 = math.rsqrt %159 : vector<16x1xf32>
    %161 = vector.broadcast %160 : vector<16x1xf32> to vector<16x32xf32>
    %162 = arith.mulf %157, %161 : vector<16x32xf32>
    %163 = vector.broadcast %143 : vector<1x32xf32> to vector<16x32xf32>
    %164 = arith.mulf %162, %163 : vector<16x32xf32>
    %165 = vector.broadcast %144 : vector<1x32xf32> to vector<16x32xf32>
    %166 = arith.addf %164, %165 : vector<16x32xf32>
    %167 = vector.shape_cast %166 : vector<16x32xf32> to vector<2x8x32xf32>
    %c0_83 = arith.constant 0 : index
    %c0_84 = arith.constant 0 : index
    %c0_85 = arith.constant 0 : index
    %168 = vector.load %arg19[%c0_83, %c0_84, %c0_85] : memref<2x8x32xf32, #tpu.memory_space<vmem>>, vector<2x8x32xf32>
    tpu.vector_store %arg19[%c0_83, %c0_84, %c0_85], %167 {strides = array<i32>} : memref<2x8x32xf32, #tpu.memory_space<vmem>>, vector<2x8x32xf32>,
    return
  }
  func.func @transform_0(%arg0: i32) -> (i32, i32, i32) {
    %c0_i32 = arith.constant 0 : i32
    %c0_i32_0 = arith.constant 0 : i32
    %c0_i32_1 = arith.constant 0 : i32
    return %arg0, %c0_i32, %c0_i32_0 : i32, i32, i32
  }
  func.func @transform_1(%arg0: i32) -> (i32, i32, i32) {
    %c0_i32 = arith.constant 0 : i32
    %c0_i32_0 = arith.constant 0 : i32
    %c0_i32_1 = arith.constant 0 : i32
    return %arg0, %c0_i32, %c0_i32_0 : i32, i32, i32
  }
  func.func @transform_2(%arg0: i32) -> (i32, i32) {
    %c0_i32 = arith.constant 0 : i32
    %c0_i32_0 = arith.constant 0 : i32
    %c0_i32_1 = arith.constant 0 : i32
    return %c0_i32, %c0_i32_0 : i32, i32
  }
  func.func @transform_3(%arg0: i32) -> (i32, i32) {
    %c0_i32 = arith.constant 0 : i32
    %c0_i32_0 = arith.constant 0 : i32
    %c0_i32_1 = arith.constant 0 : i32
    return %c0_i32, %c0_i32_0 : i32, i32
  }
  func.func @transform_4(%arg0: i32) -> (i32, i32) {
    %c0_i32 = arith.constant 0 : i32
    %c0_i32_0 = arith.constant 0 : i32
    %c0_i32_1 = arith.constant 0 : i32
    return %c0_i32, %c0_i32_0 : i32, i32
  }
  func.func @transform_5(%arg0: i32) -> (i32, i32) {
    %c0_i32 = arith.constant 0 : i32
    %c0_i32_0 = arith.constant 0 : i32
    %c0_i32_1 = arith.constant 0 : i32
    return %c0_i32, %c0_i32_0 : i32, i32
  }
  func.func @transform_6(%arg0: i32) -> (i32, i32) {
    %c0_i32 = arith.constant 0 : i32
    %c0_i32_0 = arith.constant 0 : i32
    %c0_i32_1 = arith.constant 0 : i32
    return %c0_i32, %c0_i32_0 : i32, i32
  }
  func.func @transform_7(%arg0: i32) -> (i32, i32) {
    %c0_i32 = arith.constant 0 : i32
    %c0_i32_0 = arith.constant 0 : i32
    %c0_i32_1 = arith.constant 0 : i32
    return %c0_i32, %c0_i32_0 : i32, i32
  }
  func.func @transform_8(%arg0: i32) -> (i32, i32) {
    %c0_i32 = arith.constant 0 : i32
    %c0_i32_0 = arith.constant 0 : i32
    %c0_i32_1 = arith.constant 0 : i32
    return %c0_i32, %c0_i32_0 : i32, i32
  }
  func.func @transform_9(%arg0: i32) -> (i32, i32) {
    %c0_i32 = arith.constant 0 : i32
    %c0_i32_0 = arith.constant 0 : i32
    %c0_i32_1 = arith.constant 0 : i32
    return %c0_i32, %c0_i32_0 : i32, i32
  }
  func.func @transform_10(%arg0: i32) -> (i32, i32) {
    %c0_i32 = arith.constant 0 : i32
    %c0_i32_0 = arith.constant 0 : i32
    %c0_i32_1 = arith.constant 0 : i32
    return %c0_i32, %c0_i32_0 : i32, i32
  }
  func.func @transform_11(%arg0: i32) -> (i32, i32) {
    %c0_i32 = arith.constant 0 : i32
    %c0_i32_0 = arith.constant 0 : i32
    %c0_i32_1 = arith.constant 0 : i32
    return %c0_i32, %c0_i32_0 : i32, i32
  }
  func.func @transform_12(%arg0: i32) -> (i32, i32) {
    %c0_i32 = arith.constant 0 : i32
    %c0_i32_0 = arith.constant 0 : i32
    %c0_i32_1 = arith.constant 0 : i32
    return %c0_i32, %c0_i32_0 : i32, i32
  }
  func.func @transform_13(%arg0: i32) -> (i32, i32) {
    %c0_i32 = arith.constant 0 : i32
    %c0_i32_0 = arith.constant 0 : i32
    %c0_i32_1 = arith.constant 0 : i32
    return %c0_i32, %c0_i32_0 : i32, i32
  }
  func.func @transform_14(%arg0: i32) -> (i32, i32) {
    %c0_i32 = arith.constant 0 : i32
    %c0_i32_0 = arith.constant 0 : i32
    %c0_i32_1 = arith.constant 0 : i32
    return %c0_i32, %c0_i32_0 : i32, i32
  }
  func.func @transform_15(%arg0: i32) -> (i32, i32) {
    %c0_i32 = arith.constant 0 : i32
    %c0_i32_0 = arith.constant 0 : i32
    %c0_i32_1 = arith.constant 0 : i32
    return %c0_i32, %c0_i32_0 : i32, i32
  }
  func.func @transform_16(%arg0: i32) -> (i32, i32) {
    %c0_i32 = arith.constant 0 : i32
    %c0_i32_0 = arith.constant 0 : i32
    %c0_i32_1 = arith.constant 0 : i32
    return %c0_i32, %c0_i32_0 : i32, i32
  }
  func.func @transform_17(%arg0: i32) -> (i32, i32) {
    %c0_i32 = arith.constant 0 : i32
    %c0_i32_0 = arith.constant 0 : i32
    %c0_i32_1 = arith.constant 0 : i32
    return %c0_i32, %c0_i32_0 : i32, i32
  }
  func.func @transform_18(%arg0: i32) -> (i32, i32, i32) {
    %c0_i32 = arith.constant 0 : i32
    %c0_i32_0 = arith.constant 0 : i32
    %c0_i32_1 = arith.constant 0 : i32
    return %arg0, %c0_i32, %c0_i32_0 : i32, i32, i32
  }
}

module attributes {stable_mosaic.version = 11 : i64} {
  func.func @encoder_layer_kernel(%arg0: i32, %arg1: memref<2x1x8xf32, #tpu.memory_space<vmem>>, %arg2: memref<2x8x32xf32, #tpu.memory_space<vmem>>, %arg3: memref<16x48xbf16, #tpu.memory_space<vmem>>, %arg4: memref<16x48xbf16, #tpu.memory_space<vmem>>, %arg5: memref<16x16xbf16, #tpu.memory_space<vmem>>, %arg6: memref<16x16xbf16, #tpu.memory_space<vmem>>, %arg7: memref<16x32xbf16, #tpu.memory_space<vmem>>, %arg8: memref<1x32xf32, #tpu.memory_space<vmem>>, %arg9: memref<16x32xbf16, #tpu.memory_space<vmem>>, %arg10: memref<1x32xf32, #tpu.memory_space<vmem>>, %arg11: memref<32x16xbf16, #tpu.memory_space<vmem>>, %arg12: memref<1x16xf32, #tpu.memory_space<vmem>>, %arg13: memref<32x16xbf16, #tpu.memory_space<vmem>>, %arg14: memref<1x16xf32, #tpu.memory_space<vmem>>, %arg15: memref<1x32xf32, #tpu.memory_space<vmem>>, %arg16: memref<1x32xf32, #tpu.memory_space<vmem>>, %arg17: memref<1x32xf32, #tpu.memory_space<vmem>>, %arg18: memref<1x32xf32, #tpu.memory_space<vmem>>, %arg19: memref<2x8x32xf32, #tpu.memory_space<vmem>>, %arg20: memref<2x8x16xbf16, #tpu.memory_space<vmem>>, %arg21: memref<2x8x16xbf16, #tpu.memory_space<vmem>>) attributes {dimension_semantics = [#tpu.dimension_semantics<parallel>], iteration_bounds = array<i64: 1>, scalar_prefetch = 0 : i64, scratch_operands = 2 : i64, tpu.core_type = #tpu.core_type<tc>, window_params = [{transform_indices = @transform_0, window_bounds = array<i64: 2, 1, 8>}, {transform_indices = @transform_1, window_bounds = array<i64: 2, 8, 32>}, {pipeline_mode = #tpu.pipeline_mode<synchronous>, transform_indices = @transform_2, window_bounds = array<i64: 16, 48>}, {pipeline_mode = #tpu.pipeline_mode<synchronous>, transform_indices = @transform_3, window_bounds = array<i64: 16, 48>}, {pipeline_mode = #tpu.pipeline_mode<synchronous>, transform_indices = @transform_4, window_bounds = array<i64: 16, 16>}, {pipeline_mode = #tpu.pipeline_mode<synchronous>, transform_indices = @transform_5, window_bounds = array<i64: 16, 16>}, {pipeline_mode = #tpu.pipeline_mode<synchronous>, transform_indices = @transform_6, window_bounds = array<i64: 16, 32>}, {pipeline_mode = #tpu.pipeline_mode<synchronous>, transform_indices = @transform_7, window_bounds = array<i64: 1, 32>}, {pipeline_mode = #tpu.pipeline_mode<synchronous>, transform_indices = @transform_8, window_bounds = array<i64: 16, 32>}, {pipeline_mode = #tpu.pipeline_mode<synchronous>, transform_indices = @transform_9, window_bounds = array<i64: 1, 32>}, {pipeline_mode = #tpu.pipeline_mode<synchronous>, transform_indices = @transform_10, window_bounds = array<i64: 32, 16>}, {pipeline_mode = #tpu.pipeline_mode<synchronous>, transform_indices = @transform_11, window_bounds = array<i64: 1, 16>}, {pipeline_mode = #tpu.pipeline_mode<synchronous>, transform_indices = @transform_12, window_bounds = array<i64: 32, 16>}, {pipeline_mode = #tpu.pipeline_mode<synchronous>, transform_indices = @transform_13, window_bounds = array<i64: 1, 16>}, {pipeline_mode = #tpu.pipeline_mode<synchronous>, transform_indices = @transform_14, window_bounds = array<i64: 1, 32>}, {pipeline_mode = #tpu.pipeline_mode<synchronous>, transform_indices = @transform_15, window_bounds = array<i64: 1, 32>}, {pipeline_mode = #tpu.pipeline_mode<synchronous>, transform_indices = @transform_16, window_bounds = array<i64: 1, 32>}, {pipeline_mode = #tpu.pipeline_mode<synchronous>, transform_indices = @transform_17, window_bounds = array<i64: 1, 32>}, {transform_indices = @transform_18, window_bounds = array<i64: 2, 8, 32>}]} {
    %c0 = arith.constant 0 : index
    %c0_0 = arith.constant 0 : index
    %c0_1 = arith.constant 0 : index
    %0 = vector.load %arg2[%c0, %c0_0, %c0_1] : memref<2x8x32xf32, #tpu.memory_space<vmem>>, vector<2x8x32xf32>
    %1 = vector.shape_cast %0 : vector<2x8x32xf32> to vector<16x32xf32>
    %2 = vector.extract_strided_slice %1 {offsets = [0, 0], sizes = [16, 16], strides = [1, 1]} : vector<16x32xf32> to vector<16x16xf32>
    %3 = arith.truncf %2 : vector<16x16xf32> to vector<16x16xbf16>
    %c0_2 = arith.constant 0 : index
    %c0_3 = arith.constant 0 : index
    %4 = vector.load %arg3[%c0_2, %c0_3] : memref<16x48xbf16, #tpu.memory_space<vmem>>, vector<16x48xbf16>
    %cst = arith.constant dense<0.000000e+00> : vector<16x48xf32>
    %5 = tpu.matmul %3, %4, %cst {dimension_numbers = #tpu.dot_dimension_numbers<[1], [0], [0], [1], [0, 0, 1, 1], [], []>} : vector<16x16xbf16>, vector<16x48xbf16>, vector<16x48xf32> -> vector<16x48xf32>
    %6 = arith.truncf %5 : vector<16x48xf32> to vector<16x48xbf16>
    %7 = vector.extract_strided_slice %1 {offsets = [0, 16], sizes = [16, 16], strides = [1, 1]} : vector<16x32xf32> to vector<16x16xf32>
    %8 = arith.truncf %7 : vector<16x16xf32> to vector<16x16xbf16>
    %c0_4 = arith.constant 0 : index
    %c0_5 = arith.constant 0 : index
    %9 = vector.load %arg4[%c0_4, %c0_5] : memref<16x48xbf16, #tpu.memory_space<vmem>>, vector<16x48xbf16>
    %cst_6 = arith.constant dense<0.000000e+00> : vector<16x48xf32>
    %10 = tpu.matmul %8, %9, %cst_6 {dimension_numbers = #tpu.dot_dimension_numbers<[1], [0], [0], [1], [0, 0, 1, 1], [], []>} : vector<16x16xbf16>, vector<16x48xbf16>, vector<16x48xf32> -> vector<16x48xf32>
    %11 = arith.truncf %10 : vector<16x48xf32> to vector<16x48xbf16>
    %12 = vector.shape_cast %6 : vector<16x48xbf16> to vector<2x8x48xbf16>
    %13 = vector.shape_cast %11 : vector<16x48xbf16> to vector<2x8x48xbf16>
    %c0_7 = arith.constant 0 : index
    %c0_8 = arith.constant 0 : index
    %c0_9 = arith.constant 0 : index
    %14 = vector.load %arg1[%c0_7, %c0_8, %c0_9] : memref<2x1x8xf32, #tpu.memory_space<vmem>>, vector<2x1x8xf32>
    %cst_10 = arith.constant 1.000000e+00 : f32
    %15 = vector.broadcast %cst_10 : f32 to vector<2x1x8xf32>
    %16 = arith.subf %14, %15 : vector<2x1x8xf32>
    %cst_11 = arith.constant 1.000000e+30 : f32
    %17 = vector.broadcast %cst_11 : f32 to vector<2x1x8xf32>
    %18 = arith.mulf %16, %17 : vector<2x1x8xf32>
    %19 = vector.extract_strided_slice %12 {offsets = [0, 0, 0], sizes = [2, 8, 8], strides = [1, 1, 1]} : vector<2x8x48xbf16> to vector<2x8x8xbf16>
    %20 = vector.extract_strided_slice %13 {offsets = [0, 0, 0], sizes = [2, 8, 8], strides = [1, 1, 1]} : vector<2x8x48xbf16> to vector<2x8x8xbf16>
    %21 = tpu.concatenate %19, %20 in 2 : vector<2x8x8xbf16>, vector<2x8x8xbf16> -> vector<2x8x16xbf16>
    %22 = vector.extract_strided_slice %12 {offsets = [0, 0, 16], sizes = [2, 8, 8], strides = [1, 1, 1]} : vector<2x8x48xbf16> to vector<2x8x8xbf16>
    %23 = vector.extract_strided_slice %13 {offsets = [0, 0, 16], sizes = [2, 8, 8], strides = [1, 1, 1]} : vector<2x8x48xbf16> to vector<2x8x8xbf16>
    %24 = tpu.concatenate %22, %23 in 2 : vector<2x8x8xbf16>, vector<2x8x8xbf16> -> vector<2x8x16xbf16>
    %25 = vector.extract_strided_slice %12 {offsets = [0, 0, 32], sizes = [2, 8, 8], strides = [1, 1, 1]} : vector<2x8x48xbf16> to vector<2x8x8xbf16>
    %26 = vector.extract_strided_slice %13 {offsets = [0, 0, 32], sizes = [2, 8, 8], strides = [1, 1, 1]} : vector<2x8x48xbf16> to vector<2x8x8xbf16>
    %27 = tpu.concatenate %25, %26 in 2 : vector<2x8x8xbf16>, vector<2x8x8xbf16> -> vector<2x8x16xbf16>
    "tpu.trace_start"() <{level = 10 : i32, message = "bqd,bkd->bqk"}> : () -> ()
    %cst_12 = arith.constant dense<0.000000e+00> : vector<2x8x8xf32>
    %28 = tpu.matmul %21, %24, %cst_12 {dimension_numbers = #tpu.dot_dimension_numbers<[2], [2], [1], [1], [0, 0, 0, 1, 1, 1], [0], [0]>} : vector<2x8x16xbf16>, vector<2x8x16xbf16>, vector<2x8x8xf32> -> vector<2x8x8xf32>
    "tpu.trace_stop"() : () -> ()
    %29 = vector.broadcast %18 : vector<2x1x8xf32> to vector<2x8x8xf32>
    %30 = arith.addf %28, %29 : vector<2x8x8xf32>
    %cst_13 = arith.constant dense<0xFF800000> : vector<2x8xf32>
    %31 = vector.multi_reduction <maximumf>, %30, %cst_13 [2] : vector<2x8x8xf32> to vector<2x8xf32>
    %32 = vector.shape_cast %31 : vector<2x8xf32> to vector<2x8x1xf32>
    %33 = vector.broadcast %32 : vector<2x8x1xf32> to vector<2x8x8xf32>
    %34 = arith.subf %30, %33 : vector<2x8x8xf32>
    %35 = math.exp %34 : vector<2x8x8xf32>
    %cst_14 = arith.constant dense<0.000000e+00> : vector<2x8xf32>
    %36 = vector.multi_reduction <add>, %35, %cst_14 [2] : vector<2x8x8xf32> to vector<2x8xf32>
    %37 = vector.shape_cast %36 : vector<2x8xf32> to vector<2x8x1xf32>
    %38 = tpu.reciprocal %37 {approx = true} : vector<2x8x1xf32> -> vector<2x8x1xf32>
    %39 = vector.broadcast %38 : vector<2x8x1xf32> to vector<2x8x8xf32>
    %40 = arith.mulf %35, %39 : vector<2x8x8xf32>
    %41 = arith.truncf %40 : vector<2x8x8xf32> to vector<2x8x8xbf16>
    "tpu.trace_start"() <{level = 10 : i32, message = "bqk,bkd->bqd"}> : () -> ()
    %cst_15 = arith.constant dense<0.000000e+00> : vector<2x8x16xf32>
    %42 = tpu.matmul %41, %27, %cst_15 {dimension_numbers = #tpu.dot_dimension_numbers<[2], [1], [1], [2], [0, 0, 0, 1, 1, 2], [0], [0]>} : vector<2x8x8xbf16>, vector<2x8x16xbf16>, vector<2x8x16xf32> -> vector<2x8x16xf32>
    "tpu.trace_stop"() : () -> ()
    %43 = arith.truncf %42 : vector<2x8x16xf32> to vector<2x8x16xbf16>
    %44 = vector.extract_strided_slice %43 {offsets = [0, 0, 0], sizes = [2, 8, 8], strides = [1, 1, 1]} : vector<2x8x16xbf16> to vector<2x8x8xbf16>
    %c0_16 = arith.constant 0 : index
    %c0_17 = arith.constant 0 : index
    %c0_18 = arith.constant 0 : index
    %45 = vector.load %arg20[%c0_16, %c0_17, %c0_18] : memref<2x8x16xbf16, #tpu.memory_space<vmem>>, vector<2x8x8xbf16>
    tpu.vector_store %arg20[%c0_16, %c0_17, %c0_18], %44 {strides = array<i32>} : memref<2x8x16xbf16, #tpu.memory_space<vmem>>, vector<2x8x8xbf16>,
    %46 = vector.extract_strided_slice %43 {offsets = [0, 0, 8], sizes = [2, 8, 8], strides = [1, 1, 1]} : vector<2x8x16xbf16> to vector<2x8x8xbf16>
    %c0_19 = arith.constant 0 : index
    %c0_20 = arith.constant 0 : index
    %c0_21 = arith.constant 0 : index
    %47 = vector.load %arg21[%c0_19, %c0_20, %c0_21] : memref<2x8x16xbf16, #tpu.memory_space<vmem>>, vector<2x8x8xbf16>
    tpu.vector_store %arg21[%c0_19, %c0_20, %c0_21], %46 {strides = array<i32>} : memref<2x8x16xbf16, #tpu.memory_space<vmem>>, vector<2x8x8xbf16>,
    %48 = vector.extract_strided_slice %12 {offsets = [0, 0, 8], sizes = [2, 8, 8], strides = [1, 1, 1]} : vector<2x8x48xbf16> to vector<2x8x8xbf16>
    %49 = vector.extract_strided_slice %13 {offsets = [0, 0, 8], sizes = [2, 8, 8], strides = [1, 1, 1]} : vector<2x8x48xbf16> to vector<2x8x8xbf16>
    %50 = tpu.concatenate %48, %49 in 2 : vector<2x8x8xbf16>, vector<2x8x8xbf16> -> vector<2x8x16xbf16>
    %51 = vector.extract_strided_slice %12 {offsets = [0, 0, 24], sizes = [2, 8, 8], strides = [1, 1, 1]} : vector<2x8x48xbf16> to vector<2x8x8xbf16>
    %52 = vector.extract_strided_slice %13 {offsets = [0, 0, 24], sizes = [2, 8, 8], strides = [1, 1, 1]} : vector<2x8x48xbf16> to vector<2x8x8xbf16>
    %53 = tpu.concatenate %51, %52 in 2 : vector<2x8x8xbf16>, vector<2x8x8xbf16> -> vector<2x8x16xbf16>
    %54 = vector.extract_strided_slice %12 {offsets = [0, 0, 40], sizes = [2, 8, 8], strides = [1, 1, 1]} : vector<2x8x48xbf16> to vector<2x8x8xbf16>
    %55 = vector.extract_strided_slice %13 {offsets = [0, 0, 40], sizes = [2, 8, 8], strides = [1, 1, 1]} : vector<2x8x48xbf16> to vector<2x8x8xbf16>
    %56 = tpu.concatenate %54, %55 in 2 : vector<2x8x8xbf16>, vector<2x8x8xbf16> -> vector<2x8x16xbf16>
    "tpu.trace_start"() <{level = 10 : i32, message = "bqd,bkd->bqk"}> : () -> ()
    %cst_22 = arith.constant dense<0.000000e+00> : vector<2x8x8xf32>
    %57 = tpu.matmul %50, %53, %cst_22 {dimension_numbers = #tpu.dot_dimension_numbers<[2], [2], [1], [1], [0, 0, 0, 1, 1, 1], [0], [0]>} : vector<2x8x16xbf16>, vector<2x8x16xbf16>, vector<2x8x8xf32> -> vector<2x8x8xf32>
    "tpu.trace_stop"() : () -> ()
    %58 = vector.broadcast %18 : vector<2x1x8xf32> to vector<2x8x8xf32>
    %59 = arith.addf %57, %58 : vector<2x8x8xf32>
    %cst_23 = arith.constant dense<0xFF800000> : vector<2x8xf32>
    %60 = vector.multi_reduction <maximumf>, %59, %cst_23 [2] : vector<2x8x8xf32> to vector<2x8xf32>
    %61 = vector.shape_cast %60 : vector<2x8xf32> to vector<2x8x1xf32>
    %62 = vector.broadcast %61 : vector<2x8x1xf32> to vector<2x8x8xf32>
    %63 = arith.subf %59, %62 : vector<2x8x8xf32>
    %64 = math.exp %63 : vector<2x8x8xf32>
    %cst_24 = arith.constant dense<0.000000e+00> : vector<2x8xf32>
    %65 = vector.multi_reduction <add>, %64, %cst_24 [2] : vector<2x8x8xf32> to vector<2x8xf32>
    %66 = vector.shape_cast %65 : vector<2x8xf32> to vector<2x8x1xf32>
    %67 = tpu.reciprocal %66 {approx = true} : vector<2x8x1xf32> -> vector<2x8x1xf32>
    %68 = vector.broadcast %67 : vector<2x8x1xf32> to vector<2x8x8xf32>
    %69 = arith.mulf %64, %68 : vector<2x8x8xf32>
    %70 = arith.truncf %69 : vector<2x8x8xf32> to vector<2x8x8xbf16>
    "tpu.trace_start"() <{level = 10 : i32, message = "bqk,bkd->bqd"}> : () -> ()
    %cst_25 = arith.constant dense<0.000000e+00> : vector<2x8x16xf32>
    %71 = tpu.matmul %70, %56, %cst_25 {dimension_numbers = #tpu.dot_dimension_numbers<[2], [1], [1], [2], [0, 0, 0, 1, 1, 2], [0], [0]>} : vector<2x8x8xbf16>, vector<2x8x16xbf16>, vector<2x8x16xf32> -> vector<2x8x16xf32>
    "tpu.trace_stop"() : () -> ()
    %72 = arith.truncf %71 : vector<2x8x16xf32> to vector<2x8x16xbf16>
    %73 = vector.extract_strided_slice %72 {offsets = [0, 0, 0], sizes = [2, 8, 8], strides = [1, 1, 1]} : vector<2x8x16xbf16> to vector<2x8x8xbf16>
    %c0_26 = arith.constant 0 : index
    %c0_27 = arith.constant 0 : index
    %c8 = arith.constant 8 : index
    %74 = vector.load %arg20[%c0_26, %c0_27, %c8] : memref<2x8x16xbf16, #tpu.memory_space<vmem>>, vector<2x8x8xbf16>
    tpu.vector_store %arg20[%c0_26, %c0_27, %c8], %73 {strides = array<i32>} : memref<2x8x16xbf16, #tpu.memory_space<vmem>>, vector<2x8x8xbf16>,
    %75 = vector.extract_strided_slice %72 {offsets = [0, 0, 8], sizes = [2, 8, 8], strides = [1, 1, 1]} : vector<2x8x16xbf16> to vector<2x8x8xbf16>
    %c0_28 = arith.constant 0 : index
    %c0_29 = arith.constant 0 : index
    %c8_30 = arith.constant 8 : index
    %76 = vector.load %arg21[%c0_28, %c0_29, %c8_30] : memref<2x8x16xbf16, #tpu.memory_space<vmem>>, vector<2x8x8xbf16>
    tpu.vector_store %arg21[%c0_28, %c0_29, %c8_30], %75 {strides = array<i32>} : memref<2x8x16xbf16, #tpu.memory_space<vmem>>, vector<2x8x8xbf16>,
    %c0_31 = arith.constant 0 : index
    %c0_32 = arith.constant 0 : index
    %c0_33 = arith.constant 0 : index
    %77 = vector.load %arg20[%c0_31, %c0_32, %c0_33] : memref<2x8x16xbf16, #tpu.memory_space<vmem>>, vector<2x8x16xbf16>
    %78 = vector.shape_cast %77 : vector<2x8x16xbf16> to vector<16x16xbf16>
    %c0_34 = arith.constant 0 : index
    %c0_35 = arith.constant 0 : index
    %c0_36 = arith.constant 0 : index
    %79 = vector.load %arg21[%c0_34, %c0_35, %c0_36] : memref<2x8x16xbf16, #tpu.memory_space<vmem>>, vector<2x8x16xbf16>
    %80 = vector.shape_cast %79 : vector<2x8x16xbf16> to vector<16x16xbf16>
    %c0_37 = arith.constant 0 : index
    %c0_38 = arith.constant 0 : index
    %81 = vector.load %arg5[%c0_37, %c0_38] : memref<16x16xbf16, #tpu.memory_space<vmem>>, vector<16x16xbf16>
    %cst_39 = arith.constant dense<0.000000e+00> : vector<16x16xf32>
    %82 = tpu.matmul %78, %81, %cst_39 {dimension_numbers = #tpu.dot_dimension_numbers<[1], [0], [0], [1], [0, 0, 1, 1], [], []>} : vector<16x16xbf16>, vector<16x16xbf16>, vector<16x16xf32> -> vector<16x16xf32>
    %c0_40 = arith.constant 0 : index
    %c0_41 = arith.constant 0 : index
    %83 = vector.load %arg6[%c0_40, %c0_41] : memref<16x16xbf16, #tpu.memory_space<vmem>>, vector<16x16xbf16>
    %cst_42 = arith.constant dense<0.000000e+00> : vector<16x16xf32>
    %84 = tpu.matmul %80, %83, %cst_42 {dimension_numbers = #tpu.dot_dimension_numbers<[1], [0], [0], [1], [0, 0, 1, 1], [], []>} : vector<16x16xbf16>, vector<16x16xbf16>, vector<16x16xf32> -> vector<16x16xf32>
    %85 = tpu.concatenate %82, %84 in 1 : vector<16x16xf32>, vector<16x16xf32> -> vector<16x32xf32>
    %86 = arith.addf %1, %85 : vector<16x32xf32>
    %c0_43 = arith.constant 0 : index
    %c0_44 = arith.constant 0 : index
    %87 = vector.load %arg15[%c0_43, %c0_44] : memref<1x32xf32, #tpu.memory_space<vmem>>, vector<1x32xf32>
    %c0_45 = arith.constant 0 : index
    %c0_46 = arith.constant 0 : index
    %88 = vector.load %arg16[%c0_45, %c0_46] : memref<1x32xf32, #tpu.memory_space<vmem>>, vector<1x32xf32>
    %cst_47 = arith.constant dense<0.000000e+00> : vector<16xf32>
    %89 = vector.multi_reduction <add>, %86, %cst_47 [1] : vector<16x32xf32> to vector<16xf32>
    %90 = vector.shape_cast %89 : vector<16xf32> to vector<16x1xf32>
    %cst_48 = arith.constant 3.200000e+01 : f32
    %91 = vector.broadcast %cst_48 : f32 to vector<16x1xf32>
    %92 = arith.divf %90, %91 : vector<16x1xf32>
    %93 = vector.broadcast %92 : vector<16x1xf32> to vector<16x32xf32>
    %94 = arith.subf %86, %93 : vector<16x32xf32>
    %95 = arith.mulf %94, %94 : vector<16x32xf32>
    %cst_49 = arith.constant dense<0.000000e+00> : vector<16xf32>
    %96 = vector.multi_reduction <add>, %95, %cst_49 [1] : vector<16x32xf32> to vector<16xf32>
    %97 = vector.shape_cast %96 : vector<16xf32> to vector<16x1xf32>
    %cst_50 = arith.constant 3.200000e+01 : f32
    %98 = vector.broadcast %cst_50 : f32 to vector<16x1xf32>
    %99 = arith.divf %97, %98 : vector<16x1xf32>
    %100 = vector.broadcast %92 : vector<16x1xf32> to vector<16x32xf32>
    %101 = arith.subf %86, %100 : vector<16x32xf32>
    %cst_51 = arith.constant 9.99999974E-6 : f32
    %102 = vector.broadcast %cst_51 : f32 to vector<16x1xf32>
    %103 = arith.addf %99, %102 : vector<16x1xf32>
    %104 = math.rsqrt %103 : vector<16x1xf32>
    %105 = vector.broadcast %104 : vector<16x1xf32> to vector<16x32xf32>
    %106 = arith.mulf %101, %105 : vector<16x32xf32>
    %107 = vector.broadcast %87 : vector<1x32xf32> to vector<16x32xf32>
    %108 = arith.mulf %106, %107 : vector<16x32xf32>
    %109 = vector.broadcast %88 : vector<1x32xf32> to vector<16x32xf32>
    %110 = arith.addf %108, %109 : vector<16x32xf32>
    %111 = vector.extract_strided_slice %110 {offsets = [0, 0], sizes = [16, 16], strides = [1, 1]} : vector<16x32xf32> to vector<16x16xf32>
    %112 = arith.truncf %111 : vector<16x16xf32> to vector<16x16xbf16>
    %c0_52 = arith.constant 0 : index
    %c0_53 = arith.constant 0 : index
    %113 = vector.load %arg7[%c0_52, %c0_53] : memref<16x32xbf16, #tpu.memory_space<vmem>>, vector<16x32xbf16>
    %cst_54 = arith.constant dense<0.000000e+00> : vector<16x32xf32>
    %114 = tpu.matmul %112, %113, %cst_54 {dimension_numbers = #tpu.dot_dimension_numbers<[1], [0], [0], [1], [0, 0, 1, 1], [], []>} : vector<16x16xbf16>, vector<16x32xbf16>, vector<16x32xf32> -> vector<16x32xf32>
    %c0_55 = arith.constant 0 : index
    %c0_56 = arith.constant 0 : index
    %115 = vector.load %arg8[%c0_55, %c0_56] : memref<1x32xf32, #tpu.memory_space<vmem>>, vector<1x32xf32>
    %116 = vector.broadcast %115 : vector<1x32xf32> to vector<16x32xf32>
    %117 = arith.addf %114, %116 : vector<16x32xf32>
    %cst_57 = arith.constant 0.000000e+00 : f32
    %118 = vector.broadcast %cst_57 : f32 to vector<16x32xf32>
    %119 = arith.maximumf %117, %118 : vector<16x32xf32>
    %120 = arith.truncf %119 : vector<16x32xf32> to vector<16x32xbf16>
    %121 = vector.extract_strided_slice %110 {offsets = [0, 16], sizes = [16, 16], strides = [1, 1]} : vector<16x32xf32> to vector<16x16xf32>
    %122 = arith.truncf %121 : vector<16x16xf32> to vector<16x16xbf16>
    %c0_58 = arith.constant 0 : index
    %c0_59 = arith.constant 0 : index
    %123 = vector.load %arg9[%c0_58, %c0_59] : memref<16x32xbf16, #tpu.memory_space<vmem>>, vector<16x32xbf16>
    %cst_60 = arith.constant dense<0.000000e+00> : vector<16x32xf32>
    %124 = tpu.matmul %122, %123, %cst_60 {dimension_numbers = #tpu.dot_dimension_numbers<[1], [0], [0], [1], [0, 0, 1, 1], [], []>} : vector<16x16xbf16>, vector<16x32xbf16>, vector<16x32xf32> -> vector<16x32xf32>
    %c0_61 = arith.constant 0 : index
    %c0_62 = arith.constant 0 : index
    %125 = vector.load %arg10[%c0_61, %c0_62] : memref<1x32xf32, #tpu.memory_space<vmem>>, vector<1x32xf32>
    %126 = vector.broadcast %125 : vector<1x32xf32> to vector<16x32xf32>
    %127 = arith.addf %124, %126 : vector<16x32xf32>
    %cst_63 = arith.constant 0.000000e+00 : f32
    %128 = vector.broadcast %cst_63 : f32 to vector<16x32xf32>
    %129 = arith.maximumf %127, %128 : vector<16x32xf32>
    %130 = arith.truncf %129 : vector<16x32xf32> to vector<16x32xbf16>
    %c0_64 = arith.constant 0 : index
    %c0_65 = arith.constant 0 : index
    %131 = vector.load %arg11[%c0_64, %c0_65] : memref<32x16xbf16, #tpu.memory_space<vmem>>, vector<32x16xbf16>
    %cst_66 = arith.constant dense<0.000000e+00> : vector<16x16xf32>
    %132 = tpu.matmul %120, %131, %cst_66 {dimension_numbers = #tpu.dot_dimension_numbers<[1], [0], [0], [1], [0, 0, 1, 1], [], []>} : vector<16x32xbf16>, vector<32x16xbf16>, vector<16x16xf32> -> vector<16x16xf32>
    %c0_67 = arith.constant 0 : index
    %c0_68 = arith.constant 0 : index
    %133 = vector.load %arg12[%c0_67, %c0_68] : memref<1x16xf32, #tpu.memory_space<vmem>>, vector<1x16xf32>
    %134 = vector.broadcast %133 : vector<1x16xf32> to vector<16x16xf32>
    %135 = arith.addf %132, %134 : vector<16x16xf32>
    %c0_69 = arith.constant 0 : index
    %c0_70 = arith.constant 0 : index
    %136 = vector.load %arg13[%c0_69, %c0_70] : memref<32x16xbf16, #tpu.memory_space<vmem>>, vector<32x16xbf16>
    %cst_71 = arith.constant dense<0.000000e+00> : vector<16x16xf32>
    %137 = tpu.matmul %130, %136, %cst_71 {dimension_numbers = #tpu.dot_dimension_numbers<[1], [0], [0], [1], [0, 0, 1, 1], [], []>} : vector<16x32xbf16>, vector<32x16xbf16>, vector<16x16xf32> -> vector<16x16xf32>
    %c0_72 = arith.constant 0 : index
    %c0_73 = arith.constant 0 : index
    %138 = vector.load %arg14[%c0_72, %c0_73] : memref<1x16xf32, #tpu.memory_space<vmem>>, vector<1x16xf32>
    %139 = vector.broadcast %138 : vector<1x16xf32> to vector<16x16xf32>
    %140 = arith.addf %137, %139 : vector<16x16xf32>
    %141 = tpu.concatenate %135, %140 in 1 : vector<16x16xf32>, vector<16x16xf32> -> vector<16x32xf32>
    %142 = arith.addf %110, %141 : vector<16x32xf32>
    %c0_74 = arith.constant 0 : index
    %c0_75 = arith.constant 0 : index
    %143 = vector.load %arg17[%c0_74, %c0_75] : memref<1x32xf32, #tpu.memory_space<vmem>>, vector<1x32xf32>
    %c0_76 = arith.constant 0 : index
    %c0_77 = arith.constant 0 : index
    %144 = vector.load %arg18[%c0_76, %c0_77] : memref<1x32xf32, #tpu.memory_space<vmem>>, vector<1x32xf32>
    %cst_78 = arith.constant dense<0.000000e+00> : vector<16xf32>
    %145 = vector.multi_reduction <add>, %142, %cst_78 [1] : vector<16x32xf32> to vector<16xf32>
    %146 = vector.shape_cast %145 : vector<16xf32> to vector<16x1xf32>
    %cst_79 = arith.constant 3.200000e+01 : f32
    %147 = vector.broadcast %cst_79 : f32 to vector<16x1xf32>
    %148 = arith.divf %146, %147 : vector<16x1xf32>
    %149 = vector.broadcast %148 : vector<16x1xf32> to vector<16x32xf32>
    %150 = arith.subf %142, %149 : vector<16x32xf32>
    %151 = arith.mulf %150, %150 : vector<16x32xf32>
    %cst_80 = arith.constant dense<0.000000e+00> : vector<16xf32>
    %152 = vector.multi_reduction <add>, %151, %cst_80 [1] : vector<16x32xf32> to vector<16xf32>
    %153 = vector.shape_cast %152 : vector<16xf32> to vector<16x1xf32>
    %cst_81 = arith.constant 3.200000e+01 : f32
    %154 = vector.broadcast %cst_81 : f32 to vector<16x1xf32>
    %155 = arith.divf %153, %154 : vector<16x1xf32>
    %156 = vector.broadcast %148 : vector<16x1xf32> to vector<16x32xf32>
    %157 = arith.subf %142, %156 : vector<16x32xf32>
    %cst_82 = arith.constant 9.99999974E-6 : f32
    %158 = vector.broadcast %cst_82 : f32 to vector<16x1xf32>
    %159 = arith.addf %155, %158 : vector<16x1xf32>
    %160 = math.rsqrt %159 : vector<16x1xf32>
    %161 = vector.broadcast %160 : vector<16x1xf32> to vector<16x32xf32>
    %162 = arith.mulf %157, %161 : vector<16x32xf32>
    %163 = vector.broadcast %143 : vector<1x32xf32> to vector<16x32xf32>
    %164 = arith.mulf %162, %163 : vector<16x32xf32>
    %165 = vector.broadcast %144 : vector<1x32xf32> to vector<16x32xf32>
    %166 = arith.addf %164, %165 : vector<16x32xf32>
    %167 = vector.shape_cast %166 : vector<16x32xf32> to vector<2x8x32xf32>
    %c0_83 = arith.constant 0 : index
    %c0_84 = arith.constant 0 : index
    %c0_85 = arith.constant 0 : index
    %168 = vector.load %arg19[%c0_83, %c0_84, %c0_85] : memref<2x8x32xf32, #tpu.memory_space<vmem>>, vector<2x8x32xf32>
    tpu.vector_store %arg19[%c0_83, %c0_84, %c0_85], %167 {strides = array<i32>} : memref<2x8x32xf32, #tpu.memory_space<vmem>>, vector<2x8x32xf32>,
    return
  }
  func.func @transform_0(%arg0: i32) -> (i32, i32, i32) {
    %c0_i32 = arith.constant 0 : i32
    %c0_i32_0 = arith.constant 0 : i32
    %c0_i32_1 = arith.constant 0 : i32
    return %arg0, %c0_i32, %c0_i32_0 : i32, i32, i32
  }
  func.func @transform_1(%arg0: i32) -> (i32, i32, i32) {
    %c0_i32 = arith.constant 0 : i32
    %c0_i32_0 = arith.constant 0 : i32
    %c0_i32_1 = arith.constant 0 : i32
    return %arg0, %c0_i32, %c0_i32_0 : i32, i32, i32
  }
  func.func @transform_2(%arg0: i32) -> (i32, i32) {
    %c0_i32 = arith.constant 0 : i32
    %c0_i32_0 = arith.constant 0 : i32
    %c0_i32_1 = arith.constant 0 : i32
    return %c0_i32, %c0_i32_0 : i32, i32
  }
  func.func @transform_3(%arg0: i32) -> (i32, i32) {
    %c0_i32 = arith.constant 0 : i32
    %c0_i32_0 = arith.constant 0 : i32
    %c0_i32_1 = arith.constant 0 : i32
    return %c0_i32, %c0_i32_0 : i32, i32
  }
  func.func @transform_4(%arg0: i32) -> (i32, i32) {
    %c0_i32 = arith.constant 0 : i32
    %c0_i32_0 = arith.constant 0 : i32
    %c0_i32_1 = arith.constant 0 : i32
    return %c0_i32, %c0_i32_0 : i32, i32
  }
  func.func @transform_5(%arg0: i32) -> (i32, i32) {
    %c0_i32 = arith.constant 0 : i32
    %c0_i32_0 = arith.constant 0 : i32
    %c0_i32_1 = arith.constant 0 : i32
    return %c0_i32, %c0_i32_0 : i32, i32
  }
  func.func @transform_6(%arg0: i32) -> (i32, i32) {
    %c0_i32 = arith.constant 0 : i32
    %c0_i32_0 = arith.constant 0 : i32
    %c0_i32_1 = arith.constant 0 : i32
    return %c0_i32, %c0_i32_0 : i32, i32
  }
  func.func @transform_7(%arg0: i32) -> (i32, i32) {
    %c0_i32 = arith.constant 0 : i32
    %c0_i32_0 = arith.constant 0 : i32
    %c0_i32_1 = arith.constant 0 : i32
    return %c0_i32, %c0_i32_0 : i32, i32
  }
  func.func @transform_8(%arg0: i32) -> (i32, i32) {
    %c0_i32 = arith.constant 0 : i32
    %c0_i32_0 = arith.constant 0 : i32
    %c0_i32_1 = arith.constant 0 : i32
    return %c0_i32, %c0_i32_0 : i32, i32
  }
  func.func @transform_9(%arg0: i32) -> (i32, i32) {
    %c0_i32 = arith.constant 0 : i32
    %c0_i32_0 = arith.constant 0 : i32
    %c0_i32_1 = arith.constant 0 : i32
    return %c0_i32, %c0_i32_0 : i32, i32
  }
  func.func @transform_10(%arg0: i32) -> (i32, i32) {
    %c0_i32 = arith.constant 0 : i32
    %c0_i32_0 = arith.constant 0 : i32
    %c0_i32_1 = arith.constant 0 : i32
    return %c0_i32, %c0_i32_0 : i32, i32
  }
  func.func @transform_11(%arg0: i32) -> (i32, i32) {
    %c0_i32 = arith.constant 0 : i32
    %c0_i32_0 = arith.constant 0 : i32
    %c0_i32_1 = arith.constant 0 : i32
    return %c0_i32, %c0_i32_0 : i32, i32
  }
  func.func @transform_12(%arg0: i32) -> (i32, i32) {
    %c0_i32 = arith.constant 0 : i32
    %c0_i32_0 = arith.constant 0 : i32
    %c0_i32_1 = arith.constant 0 : i32
    return %c0_i32, %c0_i32_0 : i32, i32
  }
  func.func @transform_13(%arg0: i32) -> (i32, i32) {
    %c0_i32 = arith.constant 0 : i32
    %c0_i32_0 = arith.constant 0 : i32
    %c0_i32_1 = arith.constant 0 : i32
    return %c0_i32, %c0_i32_0 : i32, i32
  }
  func.func @transform_14(%arg0: i32) -> (i32, i32) {
    %c0_i32 = arith.constant 0 : i32
    %c0_i32_0 = arith.constant 0 : i32
    %c0_i32_1 = arith.constant 0 : i32
    return %c0_i32, %c0_i32_0 : i32, i32
  }
  func.func @transform_15(%arg0: i32) -> (i32, i32) {
    %c0_i32 = arith.constant 0 : i32
    %c0_i32_0 = arith.constant 0 : i32
    %c0_i32_1 = arith.constant 0 : i32
    return %c0_i32, %c0_i32_0 : i32, i32
  }
  func.func @transform_16(%arg0: i32) -> (i32, i32) {
    %c0_i32 = arith.constant 0 : i32
    %c0_i32_0 = arith.constant 0 : i32
    %c0_i32_1 = arith.constant 0 : i32
    return %c0_i32, %c0_i32_0 : i32, i32
  }
  func.func @transform_17(%arg0: i32) -> (i32, i32) {
    %c0_i32 = arith.constant 0 : i32
    %c0_i32_0 = arith.constant 0 : i32
    %c0_i32_1 = arith.constant 0 : i32
    return %c0_i32, %c0_i32_0 : i32, i32
  }
  func.func @transform_18(%arg0: i32) -> (i32, i32, i32) {
    %c0_i32 = arith.constant 0 : i32
    %c0_i32_0 = arith.constant 0 : i32
    %c0_i32_1 = arith.constant 0 : i32
    return %arg0, %c0_i32, %c0_i32_0 : i32, i32, i32
  }
}

</mosaic_0001>

<bundles_post_ra>
// kernel: tpu_custom_call.1
= control target key start
LH: loop header
LB: loop body
LE: loop exit
PB: predicated region body
PF: predicated region fallthrough
CT: control target
= control target key end

     0   :  { %s1495_s0 = inlined_call_operand.hbm [shape: f32[2,1,8], index: 0, kind: input, shape index: {}]   ;;  %s1496_s1 = inlined_call_operand.vmem [shape: f32[2,8,32], index: 1, kind: input, shape index: {}]   ;;  %s1497_s2 = inlined_call_operand.vmem [shape: bf16[16,48], index: 2, kind: input, shape index: {}]   ;;  %s1498_s3 = inlined_call_operand.vmem [shape: bf16[16,48], index: 3, kind: input, shape index: {}]   ;;  %s1499_s4 = inlined_call_operand.vmem [shape: bf16[16,16], index: 4, kind: input, shape index: {}]   ;;  %s1500_s5 = inlined_call_operand.hbm [shape: bf16[16,16], index: 5, kind: input, shape index: {}]   ;;  %s1501_s6 = inlined_call_operand.hbm [shape: bf16[16,32], index: 6, kind: input, shape index: {}]   ;;  %s1502_s7 = inlined_call_operand.vmem [shape: f32[1,32], index: 7, kind: input, shape index: {}]   ;;  %s1503_s8 = inlined_call_operand.hbm [shape: bf16[16,32], index: 8, kind: input, shape index: {}]   ;;  %s1504_s9 = inlined_call_operand.hbm [shape: f32[1,32], index: 9, kind: input, shape index: {}]   ;;  %s1505_s10 = inlined_call_operand.vmem [shape: bf16[32,16], index: 10, kind: input, shape index: {}]   ;;  %s1506_s11 = inlined_call_operand.vmem [shape: f32[1,16], index: 11, kind: input, shape index: {}]   ;;  %s1507_s12 = inlined_call_operand.vmem [shape: bf16[32,16], index: 12, kind: input, shape index: {}]   ;;  %s1508_s13 = inlined_call_operand.vmem [shape: f32[1,16], index: 13, kind: input, shape index: {}]   ;;  %s1509_s14 = inlined_call_operand.vmem [shape: f32[1,32], index: 14, kind: input, shape index: {}]   ;;  %s1510_s15 = inlined_call_operand.vmem [shape: f32[1,32], index: 15, kind: input, shape index: {}]   ;;  %s1511_s16 = inlined_call_operand.vmem [shape: f32[1,32], index: 16, kind: input, shape index: {}]   ;;  %s1512_s17 = inlined_call_operand.vmem [shape: f32[1,32], index: 17, kind: input, shape index: {}]   ;;  %s1513_s18 = inlined_call_operand.hbm [shape: f32[2,8,32], index: 18, kind: output, shape index: {}]  }
   0x1   :  { %1515 = sst [smem:[#allocation18_spill]] %s1495_s0 }
   0x2   :  { %1516 = sst [smem:[#allocation19_spill]] %s1496_s1 }
   0x3   :  { %1517 = sst [smem:[#allocation20_spill]] %s1497_s2 }
   0x4   :  { %1518 = sst [smem:[#allocation21_spill]] %s1513_s18 }
   0x5   :  { %23 = vsyncpa [#allocation5], 0 }
   0x6   :  { %24 = vsyncpa [#allocation8], 0 }
   0x7   :  { %25 = vsyncpa [#allocation11], 0  ;;  %s52_s29 = sshll.u32 %s1500_s5, 4  ;;  %s53_s29 = int_to_ptr.hbm [resolvable:$true] %s52_s29 }
   0x8   :  { %26 = vsyncpa [#allocation6], 0  ;;  %s1173_s30 = smov [#allocation7]   ;;  %s80_s20 = sshll.u32 %s1503_s8, 4  ;;  %s81_s20 = int_to_ptr.hbm [resolvable:$true] %s80_s20 }
   0x9   :  { %s54_s0 = sshll.u32 %s1173_s30, 4  ;;  %s1174_s21 = smov 64   ;;  %s55_s0 = int_to_ptr.vmem [resolvable:$true] %s54_s0 }
   0xa   :  { %s1175_s22 = smov 4   ;;  %s1176_s2 = smov [#allocation10]  }
   0xb   :  { %60 = dma.hbm_to_vmem [thread:$0]  %s53_s29, 128, %s55_s0, [#allocation8], %s1174_s21, %s1174_s21, %s1175_s22  }
   0xc   :  { %s82_s23 = sshll.u32 %s1176_s2, 4  ;;  %s1519_s26 = sld [smem:[#allocation18_spill]]  ;;  %s83_s23 = int_to_ptr.vmem [resolvable:$true] %s82_s23 }
   0xd   :  { %88 = dma.hbm_to_vmem [thread:$0]  %s81_s20, 128, %s83_s23, [#allocation11], %s1174_s21, %s1174_s21, %s1175_s22  }
   0xe   :  { %s1177_s5 = smov [#allocation4]   ;;  %s65_s8 = sshll.u32 %s1501_s6, 4  ;;  %s66_s8 = int_to_ptr.hbm [resolvable:$true] %s65_s8 }
   0xf   :  { %s33_s28 = sshll.u32 %s1177_s5, 4  ;;  %s1178_s19 = smov 16   ;;  %s34_s28 = int_to_ptr.vmem [resolvable:$true] %s33_s28 }
  0x10   :  { %s1179_s1 = smov 1   ;;  %s1180_s29 = smov [#allocation9]  }
  0x11   :  { %s67_s0 = sshll.u32 %s1180_s29, 4  ;;  %s94_s25 = sshll.u32 %s1504_s9, 4  ;;  %s68_s0 = int_to_ptr.vmem [resolvable:$true] %s67_s0  ;;  %s95_s25 = int_to_ptr.hbm [resolvable:$true] %s94_s25 }
  0x12   :  { %s31_s27 = sshll.u32 %s1519_s26, 4  ;;  %s1181_s20 = smov [#allocation12]   ;;  %s32_s27 = int_to_ptr.hbm [resolvable:$true] %s31_s27 }
  0x13   :  { %39 = dma.hbm_to_vmem [thread:$0]  %s32_s27, 32, %s34_s28, [#allocation5], %s1178_s19, %s1178_s19, %s1179_s1  }
  0x14   :  { %73 = dma.hbm_to_vmem [thread:$0]  %s66_s8, 128, %s68_s0, [#allocation8], %s1174_s21, %s1174_s21, %s1175_s22  }
  0x15   :  { %s96_s23 = sshll.u32 %s1181_s20, 4  ;;  %s97_s23 = int_to_ptr.vmem [resolvable:$true] %s96_s23 }
  0x16   :  { %99 = dma.hbm_to_vmem [thread:$0]  %s95_s25, 16, %s97_s23, [#allocation11]  }
  0x17   :  { %1165 = dma.done.wait [#allocation5], 32  }
  0x18   :  { %1166 = vsyncadd [#allocation5], 4294967264 }
  0x19   :  { %1167 = dma.done.wait [#allocation8], 256  }
  0x1a   :  { %1168 = vsyncadd [#allocation8], 4294967040 }
  0x1b   :  { %1169 = dma.done.wait [#allocation11], 144  }
  0x1c   :  { %1170 = vsyncadd [#allocation11], 4294967152  ;;  %s1520_s26 = sld [smem:[#allocation19_spill]]  ;;  %vm148_vm0 = vcmask 130048   ;;  %v958_v4 = vld [vmem:[%s1498_s3] sm:$0xff]  ;;  %s1182_s8 = smov 112  }
  0x1d   :  { %s1521_s5 = sld [smem:[#allocation20_spill]]  ;;  %189 = vmatpush.bf16.msra.mxu1 %v958_v4  ;;  %s1183_s3 = smov 120   ;;  %vm214_vm1 = vcmask 64512   ;;  %v198_v46 = vld [vmem:[#allocation4] sm:$0x1]  ;;  %vm322_vm2 = vcmask 1043456  }
  0x1e   :  { %s1184_s1 = smov 8   ;;  %s1185_s29 = smov 104   ;;  %v199_v47 = vld [vmem:[#allocation4 + $0x1] sm:$0x1]  ;;  %v901_v48 = vadd.f32 -1.0, %v198_v46  ;;  %vm358_vm3 = vcmask 60416  }
  0x1f   :  { %s1186_s0 = smov 96   ;;  %v902_v49 = vadd.f32 -1.0, %v199_v47  ;;  %s1187_s2 = smov 88   ;;  %vm513_vm4 = vcmask 126016   ;;  %vm596_vm5 = vcmask 261120  }
  0x20   :  { %v202_v50 = vmul.f32 1e+30, %v901_v48  ;;  %s1190_s24 = smov 128  }
  0x21   :  { %v203_v51 = vmul.f32 1e+30, %v902_v49 }
  0x22   :  { %v1306_v0 = vld [vmem:[%s1520_s26] sm:$0xff]  ;;  %v1311_v1 = vld [vmem:[%s1520_s26 + $0x8] sm:$0xff]  ;;  %v257_v52 = vperm.slane %v202_v50, 0 }
  0x23   :  { %v957_v2 = vld [vmem:[%s1521_s5] sm:$0xff]  ;;  %v139_v3 = vpack.c.bf16 %v1311_v1, %v1306_v0  ;;  %v258_v53 = vperm.slane %v203_v51, 0 }
  0x24   :  { %159 = vmatpush.bf16.msra.mxu0 %v957_v2 }
  0x25   :  { %171 = vrot.lane.b32.xlu0 %v139_v3, %s1182_s8 }
  0x27   :  { %895 = vmatmul.msk.bf16.vlgmr.msra.gmra.mxu0 %vm148_vm0, %v139_v3 }
  0x97   :  { %v172_v5 = vpop.permute.xlu0 %171 }
  0x98   :  { %900 = vmatmul.msk.bf16.vlgmr.msra.gmra.mxu1 %vm148_vm0, %v172_v5 }
  0xa4   :  { %v161_v6 = vpop.f32.mrf.mxu0 }
  0xa5   :  { %v166_v7 = vpack.c.bf16 %v161_v6, %v161_v6 }
  0xa7   :  { %v223_v8 = vunpack.c.l.b16 %v166_v7 }
  0xa9   :  { %v1324_v9 = vpack.c.b16 %v223_v8, %v223_v8 }
  0xab   :  { %227 = vrot.lane.b32.xlu0 %v1324_v9, %s1182_s8 }
  0xac   :  { %v163_v10 = vpop.f32.mrf.mxu0 }
  0xad   :  { %v167_v11 = vpack.c.bf16 %v163_v10, %v163_v10 }
  0xaf   :  { %v224_v12 = vunpack.c.l.b16 %v167_v11 }
  0xb1   :  { %v1328_v13 = vpack.c.b16 %v224_v12, %v224_v12 }
  0xb3   :  { %229 = vrot.lane.b32.xlu1 %v1328_v13, %s1182_s8 }
 0x115   :  { %v191_v14 = vpop.f32.mrf.mxu1 }
 0x116   :  { %v196_v15 = vpack.c.bf16 %v191_v14, %v191_v14 }
 0x118   :  { %v206_v16 = vunpack.c.l.b16 %v196_v15 }
 0x11a   :  { %v1332_v17 = vpack.c.b16 %v206_v16, %v206_v16 }
 0x11c   :  { %231 = vrot.lane.b32.xlu1 %v1332_v17, %s1183_s3 }
 0x11d   :  { %v193_v18 = vpop.f32.mrf.mxu1  ;;  %v228_v26 = vpop.permute.xlu0 %227 }
 0x11e   :  { %v197_v19 = vpack.c.bf16 %v193_v18, %v193_v18 }
 0x120   :  { %v207_v20 = vunpack.c.l.b16 %v197_v19 }
 0x122   :  { %v1336_v21 = vpack.c.b16 %v207_v20, %v207_v20 }
 0x124   :  { %233 = vrot.lane.b32.xlu2 %v1336_v21, %s1183_s3  ;;  %212 = vrot.lane.b32.xlu0 %v1336_v21, %s1184_s1 }
 0x125   :  { %381 = vrot.lane.b32.xlu1 %v1324_v9, %s1185_s29  ;;  %v230_v22 = vpop.permute.xlu1 %229 }
 0x12c   :  { %210 = vrot.lane.b32.xlu2 %v1332_v17, %s1184_s1  ;;  %385 = vrot.lane.b32.xlu0 %v1332_v17, %s1182_s8 }
 0x12d   :  { %387 = vrot.lane.b32.xlu1 %v1336_v21, %s1182_s8 }
 0x134   :  { %373 = vrot.lane.b32.xlu0 %v1328_v13, %s1183_s3  ;;  %383 = vrot.lane.b32.xlu2 %v1328_v13, %s1185_s29 }
 0x13c   :  { %241 = vrot.lane.b32.xlu0 %v1324_v9, %s1186_s0  ;;  %371 = vrot.lane.b32.xlu2 %v1324_v9, %s1183_s3 }
 0x17e   :  { %v234_v23 = vpop.permute.xlu2 %233 }
 0x17f   :  { %v240_v24 = vsel %vm214_vm1, %v230_v22, %v234_v23 }
 0x180   :  { %v280_v25 = vsel %vm148_vm0, %v240_v24, 0 }
 0x181   :  { %289 = vmatpush.bf16.xpose.msra.mxu3 %v280_v25 }
 0x186   :  { %v211_v29 = vpop.permute.xlu2 %210 }
 0x187   :  { %v217_v33 = vsel %vm214_vm1, %v166_v7, %v211_v29 }
 0x18e   :  { %v232_v27 = vpop.permute.xlu1 %231  ;;  %v384_v35 = vpop.permute.xlu2 %383 }
 0x18f   :  { %v237_v28 = vsel %vm214_vm1, %v228_v26, %v232_v27 }
 0x190   :  { %v263_v30 = vsel %vm148_vm0, %v237_v28, 0 }
 0x191   :  { %272 = vmatpush.bf16.xpose.msra.mxu2 %v263_v30 }
 0x196   :  { %v213_v31 = vpop.permute.xlu0 %212  ;;  %v372_v42 = vpop.permute.xlu2 %371 }
 0x197   :  { %v382_v32 = vpop.permute.xlu1 %381  ;;  %v220_v34 = vsel %vm214_vm1, %v167_v11, %v213_v31  ;;  %v377_v44 = vsel %vm214_vm1, %v372_v42, %v196_v15 }
 0x198   :  { %903 = vmatmul.msk.bf16.vlgmr.msra.gmra.mxu2 %vm148_vm0, %v217_v33  ;;  %904 = vmatmul.msk.bf16.vlgmr.msra.gmra.mxu3 %vm148_vm0, %v220_v34 }
 0x19e   :  { %v386_v36 = vpop.permute.xlu0 %385 }
 0x19f   :  { %v388_v37 = vpop.permute.xlu1 %387  ;;  %v391_v38 = vsel %vm214_vm1, %v382_v32, %v386_v36 }
 0x1a0   :  { %v411_v39 = vsel %vm148_vm0, %v391_v38, 0  ;;  %v394_v40 = vsel %vm214_vm1, %v384_v35, %v388_v37 }
 0x1a1   :  { %420 = vmatpush.bf16.xpose.msrb.mxu2 %v411_v39  ;;  %v428_v41 = vsel %vm148_vm0, %v394_v40, 0 }
 0x1a2   :  { %437 = vmatpush.bf16.xpose.msrb.mxu3 %v428_v41 }
 0x1a6   :  { %v374_v43 = vpop.permute.xlu0 %373 }
 0x1a7   :  { %v380_v45 = vsel %vm214_vm1, %v374_v43, %v197_v19 }
 0x1a8   :  { %907 = vmatmul.msk.bf16.vlgmr.msrb.gmra.mxu2 %vm148_vm0, %v377_v44 }
 0x1a9   :  { %908 = vmatmul.msk.bf16.vlgmr.msrb.gmra.mxu3 %vm148_vm0, %v380_v45 }
 0x1ae   :  { %v242_v25 = vpop.permute.xlu0 %241 }
 0x21b   :  { %v274_v54 = vpop.f32.mrf.mxu2  ;;  %v291_v55 = vpop.f32.mrf.mxu3 }
 0x21c   :  { %v275_v56 = vadd.f32 %v274_v54, %v257_v52  ;;  %v292_v57 = vadd.f32 %v291_v55, %v258_v53 }
 0x21e   :  { %v295_v58 = vsel %vm214_vm1, %v275_v56, -inf  ;;  %v298_v59 = vsel %vm214_vm1, %v292_v57, -inf }
 0x21f   :  { %296 = vmax.xlane.f32.xlu1 %v295_v58  ;;  %299 = vmax.xlane.f32.xlu2 %v298_v59 }
 0x223   :  { %v276_v60 = vpop.f32.mrf.mxu2  ;;  %v293_v61 = vpop.f32.mrf.mxu3 }
 0x22b   :  { %v422_v62 = vpop.f32.mrf.mxu2 }
 0x22c   :  { %v423_v63 = vadd.f32 %v422_v62, %v257_v52  ;;  %v439_v2 = vpop.f32.mrf.mxu3 }
 0x22d   :  { %v440_v3 = vadd.f32 %v439_v2, %v258_v53 }
 0x22e   :  { %v443_v4 = vsel %vm214_vm1, %v423_v63, -inf }
 0x22f   :  { %444 = vmax.xlane.f32.xlu0 %v443_v4  ;;  %v446_v5 = vsel %vm214_vm1, %v440_v3, -inf }
 0x230   :  { %447 = vmax.xlane.f32.xlu2 %v446_v5 }
 0x233   :  { %v424_v6 = vpop.f32.mrf.mxu2 }
 0x234   :  { %v441_v7 = vpop.f32.mrf.mxu3 }
 0x243   :  { %247 = vrot.lane.b32.xlu0 %v1336_v21, %s1185_s29 }
 0x248   :  { %245 = vrot.lane.b32.xlu2 %v1332_v17, %s1185_s29 }
 0x292   :  { %v297_v8 = vpop.xlane.xlu1 %296  ;;  %v300_v10 = vpop.xlane.xlu2 %299 }
 0x293   :  { %v301_v11 = vsub.f32 %v275_v56, %v297_v8  ;;  %v302_v12 = vsub.f32 %v292_v57, %v300_v10 }
 0x295   :  { %v303_v14 = vmul.f32 1.442695, %v301_v11  ;;  %v305_v15 = vmul.f32 1.442695, %v302_v12  ;;  %v962_v12 = vld [vmem:[#allocation7] sm:$0xff] }
 0x296   :  { %575 = vmatpush.bf16.msra.mxu3 %v962_v12 }
 0x297   :  { %995 = vpow2.f32 %v303_v14 }
 0x298   :  { %997 = vpow2.f32 %v305_v15 }
 0x29d   :  { %v996_v16 = vpop.eup %995 }
 0x29e   :  { %v998_v18 = vpop.eup %997  ;;  %v307_v19 = vsel %vm214_vm1, %v996_v16, 0.0 }
 0x29f   :  { %308 = vadd.xlane.f32.xlu1 %v307_v19  ;;  %v310_v20 = vsel %vm214_vm1, %v998_v18, 0.0 }
 0x2a0   :  { %311 = vadd.xlane.f32.xlu2 %v310_v20 }
 0x2a2   :  { %v445_v31 = vpop.xlane.xlu0 %444 }
 0x2a3   :  { %v448_v22 = vpop.xlane.xlu2 %447  ;;  %v449_v32 = vsub.f32 %v423_v63, %v445_v31 }
 0x2a4   :  { %v450_v23 = vsub.f32 %v440_v3, %v448_v22 }
 0x2a5   :  { %v451_v33 = vmul.f32 1.442695, %v449_v32 }
 0x2a6   :  { %v453_v24 = vmul.f32 1.442695, %v450_v23 }
 0x2a8   :  { %999 = vpow2.f32 %v453_v24 }
 0x2a9   :  { %1001 = vpow2.f32 %v451_v33 }
 0x2ab   :  { %v246_v26 = vpop.permute.xlu2 %245 }
 0x2ac   :  { %v251_v27 = vsel %vm214_vm1, %v242_v25, %v246_v26 }
 0x2ad   :  { %v323_v28 = vsel %vm322_vm2, %v251_v27, 0 }
 0x2ae   :  { %v1000_v29 = vpop.eup %999  ;;  %332 = vmatpush.bf16.msrb.mxu0 %v323_v28 }
 0x2af   :  { %v458_v30 = vsel %vm214_vm1, %v1000_v29, 0.0  ;;  %v1002_v34 = vpop.eup %1001 }
 0x2b0   :  { %459 = vadd.xlane.f32.xlu0 %v458_v30  ;;  %v455_v35 = vsel %vm214_vm1, %v1002_v34, 0.0 }
 0x2b5   :  { %v248_v40 = vpop.permute.xlu0 %247 }
 0x2b8   :  { %395 = vrot.lane.b32.xlu2 %v1324_v9, %s1187_s2  ;;  %243 = vrot.lane.b32.xlu1 %v1328_v13, %s1186_s0 }
 0x2c0   :  { %397 = vrot.lane.b32.xlu2 %v1328_v13, %s1187_s2 }
 0x2c8   :  { %399 = vrot.lane.b32.xlu2 %v1332_v17, %s1186_s0 }
 0x2d0   :  { %401 = vrot.lane.b32.xlu2 %v1336_v21, %s1186_s0  ;;  %s1522_s0 = sld [smem:[#allocation21_spill]] }
 0x2d6   :  { %s876_s2 = sshll.u32 %s1522_s0, 4  ;;  %s877_s2 = int_to_ptr.hbm [resolvable:$true] %s876_s2 }
 0x2e2   :  { %456 = vadd.xlane.f32.xlu1 %v455_v35 }
 0x312   :  { %v309_v9 = vpop.xlane.xlu1 %308 }
 0x313   :  { %1003 = vrcp.f32 %v309_v9  ;;  %v312_v36 = vpop.xlane.xlu2 %311 }
 0x314   :  { %1005 = vrcp.f32 %v312_v36 }
 0x319   :  { %v1004_v37 = vpop.eup %1003 }
 0x31a   :  { %v315_v38 = vmul.f32 %v1004_v37, %v996_v16  ;;  %v1006_v41 = vpop.eup %1005 }
 0x31b   :  { %v396_v13 = vpop.permute.xlu2 %395  ;;  %v316_v21 = vmul.f32 %v1006_v41, %v998_v18  ;;  %v961_v18 = vld [vmem:[%s1499_s4] sm:$0xff] }
 0x31c   :  { %v317_v39 = vpack.c.bf16 %v315_v38, %v315_v38  ;;  %545 = vmatpush.bf16.msra.mxu2 %v961_v18  ;;  %v965_v18 = vld [vmem:[%s1505_s10] sm:$0xff] }
 0x31d   :  { %v318_v49 = vpack.c.bf16 %v316_v21, %v316_v21 }
 0x31e   :  { %905 = vmatmul.msk.bf16.vlgmr.msrb.gmra.mxu0 %vm214_vm1, %v317_v39 }
 0x323   :  { %v398_v17 = vpop.permute.xlu2 %397  ;;  %v460_v48 = vpop.xlane.xlu0 %459 }
 0x324   :  { %1007 = vrcp.f32 %v460_v48 }
 0x32a   :  { %v244_v42 = vpop.permute.xlu1 %243  ;;  %v1008_v53 = vpop.eup %1007 }
 0x32b   :  { %v400_v43 = vpop.permute.xlu2 %399  ;;  %v254_v44 = vsel %vm214_vm1, %v244_v42, %v248_v40  ;;  %v464_v54 = vmul.f32 %v1008_v53, %v1000_v29 }
 0x32c   :  { %v405_v45 = vsel %vm214_vm1, %v396_v13, %v400_v43  ;;  %v341_v46 = vsel %vm322_vm2, %v254_v44, 0 }
 0x32d   :  { %v470_v47 = vsel %vm322_vm2, %v405_v45, 0  ;;  %350 = vmatpush.bf16.msrb.mxu1 %v341_v46  ;;  %v466_v55 = vpack.c.bf16 %v464_v54, %v464_v54  ;;  %v963_v45 = vld [vmem:[#allocation9] sm:$0xff] }
 0x32e   :  { %479 = vmatpush.bf16.msra.mxu0 %v470_v47 }
 0x330   :  { %906 = vmatmul.msk.bf16.vlgmr.msrb.gmra.mxu1 %vm214_vm1, %v318_v49  ;;  %v964_v49 = vld [vmem:[#allocation10] sm:$0xff] }
 0x332   :  { %681 = vmatpush.bf16.msrb.mxu0 %v963_v45 }
 0x333   :  { %v402_v50 = vpop.permute.xlu2 %401 }
 0x334   :  { %v408_v51 = vsel %vm214_vm1, %v398_v17, %v402_v50 }
 0x335   :  { %v488_v52 = vsel %vm322_vm2, %v408_v51, 0 }
 0x336   :  { %497 = vmatpush.bf16.msra.mxu1 %v488_v52 }
 0x33a   :  { %716 = vmatpush.bf16.msrb.mxu1 %v964_v49 }
 0x340   :  { %910 = vmatmul.msk.bf16.vlgmr.msra.gmra.mxu1 %vm214_vm1, %v466_v55 }
 0x355   :  { %v457_v56 = vpop.xlane.xlu1 %456 }
 0x356   :  { %1009 = vrcp.f32 %v457_v56 }
 0x35c   :  { %v1010_v57 = vpop.eup %1009 }
 0x35d   :  { %v463_v58 = vmul.f32 %v1010_v57, %v1002_v34  ;;  %v1188_v34 = vmov 32.0  }
 0x35e   :  { %1011 = vrcp.f32 %v1188_v34 }
 0x35f   :  { %v465_v59 = vpack.c.bf16 %v463_v58, %v463_v58 }
 0x361   :  { %909 = vmatmul.msk.bf16.vlgmr.msra.gmra.mxu0 %vm214_vm1, %v465_v59 }
 0x364   :  { %v1012_v35 = vpop.eup %1011 }
 0x365   :  { %v604_v9 = vmul.f32 32.0, %v1012_v35  ;;  %vm608_vm6 = vweird.f32 %v1012_v35 }
 0x367   :  { %v605_v36 = vsub.f32 1.0, %v604_v9 }
 0x369   :  { %v606_v37 = vmul.f32 %v1012_v35, %v605_v36 }
 0x36b   :  { %v607_v38 = vadd.f32 %v1012_v35, %v606_v37 }
 0x39b   :  { %v334_v60 = vpop.f32.mrf.mxu0 }
 0x39c   :  { %v356_v61 = vpack.c.bf16 %v334_v60, %v334_v60 }
 0x39e   :  { %359 = vst.msk [vmem:[#allocation2] sm:$0xf] %vm358_vm3, %v356_v61  ;;  %363 = vrot.lane.b32.xlu2 %v356_v61, %s1183_s3 }
 0x3a3   :  { %v336_v62 = vpop.f32.mrf.mxu0 }
 0x3ad   :  { %v352_v63 = vpop.f32.mrf.mxu1 }
 0x3ae   :  { %v357_v2 = vpack.c.bf16 %v352_v63, %v352_v63 }
 0x3b0   :  { %360 = vst.msk [vmem:[#allocation2 + $0x4] sm:$0xf] %vm358_vm3, %v357_v2  ;;  %365 = vrot.lane.b32.xlu1 %v357_v2, %s1183_s3 }
 0x3b5   :  { %v354_v3 = vpop.f32.mrf.mxu1 }
 0x3bd   :  { %v499_v4 = vpop.f32.mrf.mxu1 }
 0x3be   :  { %v504_v5 = vpack.c.bf16 %v499_v4, %v499_v4  ;;  %v987_v4 = vld [vmem:[%s1509_s14] ss:$0 sm:$0xff] }
 0x3c0   :  { %509 = vrot.lane.b32.xlu2 %v504_v5, %s1184_s1 }
 0x3c5   :  { %v501_v6 = vpop.f32.mrf.mxu1 }
 0x3de   :  { %v481_v7 = vpop.f32.mrf.mxu0 }
 0x3df   :  { %v503_v8 = vpack.c.bf16 %v481_v7, %v481_v7 }
 0x3e1   :  { %507 = vrot.lane.b32.xlu0 %v503_v8, %s1184_s1 }
 0x3e6   :  { %v483_v10 = vpop.f32.mrf.mxu0 }
 0x3e7   :  { %v988_v10 = vld [vmem:[%s1510_s15] ss:$0 sm:$0xff] }
 0x3f8   :  { %v364_v11 = vpop.permute.xlu2 %363 }
 0x3f9   :  { %369 = vst.msk [vmem:[#allocation3] sm:$0xf] %vm358_vm3, %v364_v11 }
 0x3fa   :  { %516 = vst.msk [vmem:[#allocation3] sm:$0xf] %vm513_vm4, %v503_v8 }
 0x41a   :  { %v510_v14 = vpop.permute.xlu2 %509 }
 0x41b   :  { %515 = vst.msk [vmem:[#allocation2 + $0x4] sm:$0xf] %vm513_vm4, %v510_v14 }
 0x422   :  { %v366_v15 = vpop.permute.xlu1 %365 }
 0x423   :  { %370 = vst.msk [vmem:[#allocation3 + $0x4] sm:$0xf] %vm358_vm3, %v366_v15 }
 0x424   :  { %517 = vst.msk [vmem:[#allocation3 + $0x4] sm:$0xf] %vm513_vm4, %v504_v5 }
 0x42b   :  { %v960_v16 = vld [vmem:[#allocation3] sm:$0xff] }
 0x42c   :  { %928 = vmatmul.msk.bf16.vlgmr.msra.gmra.mxu3 %vm148_vm0, %v960_v16  ;;  %v966_v16 = vld [vmem:[%s1505_s10 + $0x8] sm:$0xff] }
 0x42d   :  { %755 = vmatpush.bf16.msrb.mxu2 %v966_v16 }
 0x431   :  { %756 = vmatpush.bf16.msrb.mxu2 %v965_v18 }
 0x453   :  { %v508_v19 = vpop.permute.xlu0 %507 }
 0x454   :  { %514 = vst.msk [vmem:[#allocation2] sm:$0xf] %vm513_vm4, %v508_v19 }
 0x45b   :  { %v959_v20 = vld [vmem:[#allocation2] sm:$0xff] }
 0x45c   :  { %919 = vmatmul.msk.bf16.vlgmr.msra.gmra.mxu2 %vm148_vm0, %v959_v20 }
 0x4af   :  { %v577_v22 = vpop.f32.mrf.mxu3 }
 0x4b0   :  { %584 = vrot.lane.b32.xlu2 %v577_v22, %s1178_s19  ;;  %v989_v22 = vld [vmem:[%s1502_s7] ss:$0 sm:$0xff] }
 0x4b7   :  { %v579_v23 = vpop.f32.mrf.mxu3 }
 0x4b8   :  { %586 = vrot.lane.b32.xlu2 %v579_v23, %s1178_s19 }
 0x4df   :  { %v547_v24 = vpop.f32.mrf.mxu2 }
 0x4e7   :  { %v549_v29 = vpop.f32.mrf.mxu2 }
 0x50a   :  { %v585_v25 = vpop.permute.xlu2 %584 }
 0x50b   :  { %v590_v26 = vsel %vm148_vm0, %v547_v24, %v585_v25 }
 0x50c   :  { %v592_v27 = vadd.f32 %v590_v26, %v1306_v0  ;;  %v1431_v0 = vsel %vm608_vm6, %v1012_v35, %v607_v38  ;;  %v992_v38 = vld [vmem:[%s1508_s13] ss:$0 sm:$0xff] }
 0x50e   :  { %v597_v28 = vsel %vm596_vm5, %v592_v27, 0.0 }
 0x50f   :  { %598 = vadd.xlane.f32.xlu0 %v597_v28 }
 0x512   :  { %v587_v30 = vpop.permute.xlu2 %586 }
 0x513   :  { %v591_v31 = vsel %vm148_vm0, %v549_v29, %v587_v30  ;;  %v968_v29 = vld [vmem:[%s1507_s12 + $0x8] sm:$0xff]  ;;  %v967_v30 = vld [vmem:[%s1507_s12] sm:$0xff] }
 0x514   :  { %v593_v32 = vadd.f32 %v591_v31, %v1311_v1  ;;  %792 = vmatpush.bf16.msrb.mxu3 %v968_v29 }
 0x516   :  { %v600_v33 = vsel %vm596_vm5, %v593_v32, 0.0 }
 0x517   :  { %601 = vadd.xlane.f32.xlu1 %v600_v33 }
 0x518   :  { %793 = vmatpush.bf16.msrb.mxu3 %v967_v30 }
 0x582   :  { %v599_v13 = vpop.xlane.xlu0 %598 }
 0x583   :  { %v610_v39 = vmul.f32 %v1431_v0, %v599_v13 }
 0x585   :  { %v612_v17 = vsub.f32 %v592_v27, %v610_v39 }
 0x587   :  { %v614_v40 = vmul.f32 %v612_v17, %v612_v17 }
 0x589   :  { %v616_v1 = vsel %vm596_vm5, %v614_v40, 0.0 }
 0x58a   :  { %617 = vadd.xlane.f32.xlu2 %v616_v1  ;;  %v602_v41 = vpop.xlane.xlu1 %601  ;;  %v991_v1 = vld [vmem:[%s1506_s11] ss:$0 sm:$0xff] }
 0x58b   :  { %v611_v21 = vmul.f32 %v1431_v0, %v602_v41 }
 0x58d   :  { %v613_v42 = vsub.f32 %v593_v32, %v611_v21  ;;  %v990_v32 = vld [vmem:[#allocation12] ss:$0 sm:$0xff] }
 0x58f   :  { %v615_v43 = vmul.f32 %v613_v42, %v613_v42 }
 0x591   :  { %v619_v44 = vsel %vm596_vm5, %v615_v43, 0.0 }
 0x592   :  { %620 = vadd.xlane.f32.xlu0 %v619_v44 }
 0x5fd   :  { %v618_v46 = vpop.xlane.xlu2 %617 }
 0x5fe   :  { %v622_v47 = vmul.f32 %v618_v46, %v1431_v0 }
 0x600   :  { %v624_v48 = vadd.f32 1e-05, %v622_v47 }
 0x602   :  { %1013 = vrsqrt.f32 %v624_v48  ;;  %vm632_vm8 = vweird.f32 %v624_v48 }
 0x605   :  { %v621_v50 = vpop.xlane.xlu0 %620 }
 0x606   :  { %v623_v51 = vmul.f32 %v621_v50, %v1431_v0 }
 0x608   :  { %v1014_v52 = vpop.eup %1013  ;;  %v625_v53 = vadd.f32 1e-05, %v623_v51 }
 0x609   :  { %v627_v54 = vmul.f32 %v1014_v52, %v624_v48  ;;  %vm633_vm7 = vweird.f32 %v1014_v52 }
 0x60a   :  { %1015 = vrsqrt.f32 %v625_v53  ;;  %vm634_vm9 = vmor %vm632_vm8, %vm633_vm7  ;;  %vm642_vm11 = vweird.f32 %v625_v53 }
 0x60b   :  { %v628_v55 = vmul.f32 %v1014_v52, %v627_v54 }
 0x60d   :  { %v629_v56 = vmul.f32 0.5, %v628_v55 }
 0x60f   :  { %v630_v57 = vsub.f32 1.5, %v629_v56 }
 0x610   :  { %v1016_v58 = vpop.eup %1015 }
 0x611   :  { %v631_v59 = vmul.f32 %v1014_v52, %v630_v57  ;;  %v637_v60 = vmul.f32 %v1016_v58, %v625_v53  ;;  %vm643_vm10 = vweird.f32 %v1016_v58 }
 0x612   :  { %vm644_vm12 = vmor %vm642_vm11, %vm643_vm10 }
 0x613   :  { %v638_v61 = vmul.f32 %v1016_v58, %v637_v60  ;;  %v635_v62 = vsel %vm634_vm9, %v1014_v52, %v631_v59 }
 0x614   :  { %v646_v3 = vmul.f32 %v635_v62, %v612_v17 }
 0x615   :  { %v639_v63 = vmul.f32 0.5, %v638_v61 }
 0x616   :  { %v651_v8 = vmul.f32 %v987_v4, %v646_v3 }
 0x617   :  { %v640_v2 = vsub.f32 1.5, %v639_v63 }
 0x618   :  { %v656_v12 = vadd.f32 %v988_v10, %v651_v8 }
 0x619   :  { %v641_v5 = vmul.f32 %v1016_v58, %v640_v2 }
 0x61b   :  { %v645_v6 = vsel %vm644_vm12, %v1016_v58, %v641_v5 }
 0x61c   :  { %v647_v7 = vmul.f32 %v645_v6, %v613_v42 }
 0x61e   :  { %v652_v11 = vmul.f32 %v987_v4, %v647_v7 }
 0x620   :  { %v657_v14 = vadd.f32 %v988_v10, %v652_v11  ;;  %v993_v10 = vld [vmem:[%s1511_s16] ss:$0 sm:$0xff]  ;;  %s1189_s16 = smov [#allocation13]  }
 0x622   :  { %v658_v15 = vpack.c.bf16 %v657_v14, %v656_v12 }
 0x624   :  { %698 = vrot.lane.b32.xlu1 %v658_v15, %s1182_s8  ;;  %933 = vmatmul.msk.bf16.vlgmr.msrb.gmra.mxu0 %vm148_vm0, %v658_v15 }
 0x696   :  { %v699_v19 = vpop.permute.xlu1 %698 }
 0x697   :  { %938 = vmatmul.msk.bf16.vlgmr.msrb.gmra.mxu1 %vm148_vm0, %v699_v19 }
 0x6a1   :  { %v683_v20 = vpop.f32.mrf.mxu0 }
 0x6a2   :  { %v684_v23 = vadd.f32 %v989_v22, %v683_v20 }
 0x6a4   :  { %v688_v26 = vmax.f32 %v684_v23, 0.0 }
 0x6a9   :  { %v685_v24 = vpop.f32.mrf.mxu0 }
 0x6aa   :  { %v686_v25 = vadd.f32 %v989_v22, %v685_v24 }
 0x6ac   :  { %v689_v27 = vmax.f32 %v686_v25, 0.0 }
 0x6ae   :  { %v690_v28 = vpack.c.bf16 %v689_v27, %v688_v26 }
 0x6b0   :  { %947 = vmatmul.msk.bf16.vlgmr.msrb.gmra.mxu2 %vm596_vm5, %v690_v28 }
 0x714   :  { %v718_v31 = vpop.f32.mrf.mxu1 }
 0x715   :  { %v719_v33 = vadd.f32 %v990_v32, %v718_v31 }
 0x717   :  { %v723_v9 = vmax.f32 %v719_v33, 0.0 }
 0x71c   :  { %v720_v34 = vpop.f32.mrf.mxu1 }
 0x71d   :  { %v721_v35 = vadd.f32 %v990_v32, %v720_v34 }
 0x71f   :  { %v724_v36 = vmax.f32 %v721_v35, 0.0 }
 0x721   :  { %v725_v37 = vpack.c.bf16 %v724_v36, %v723_v9 }
 0x723   :  { %956 = vmatmul.msk.bf16.vlgmr.msrb.gmra.mxu3 %vm596_vm5, %v725_v37 }
 0x733   :  { %v758_v41 = vpop.f32.mrf.mxu2 }
 0x734   :  { %v759_v21 = vadd.f32 %v991_v1, %v758_v41 }
 0x73b   :  { %v760_v46 = vpop.f32.mrf.mxu2 }
 0x73c   :  { %v761_v47 = vadd.f32 %v991_v1, %v760_v46 }
 0x7a6   :  { %v795_v13 = vpop.f32.mrf.mxu3 }
 0x7a7   :  { %v796_v39 = vadd.f32 %v992_v38, %v795_v13 }
 0x7a9   :  { %802 = vrot.lane.b32.xlu2 %v796_v39, %s1178_s19 }
 0x7ae   :  { %v797_v17 = vpop.f32.mrf.mxu3 }
 0x7af   :  { %v798_v40 = vadd.f32 %v992_v38, %v797_v17 }
 0x7b1   :  { %804 = vrot.lane.b32.xlu0 %v798_v40, %s1178_s19 }
 0x803   :  { %v803_v42 = vpop.permute.xlu2 %802 }
 0x804   :  { %v808_v43 = vsel %vm148_vm0, %v759_v21, %v803_v42 }
 0x805   :  { %v810_v44 = vadd.f32 %v808_v43, %v656_v12  ;;  %v994_v12 = vld [vmem:[%s1512_s17] ss:$0 sm:$0xff]  ;;  %s874_s17 = sshll.u32 %s1189_s16, 4  ;;  %s875_s17 = int_to_ptr.vmem [resolvable:$true] %s874_s17 }
 0x807   :  { %v814_v45 = vsel %vm596_vm5, %v810_v44, 0.0 }
 0x808   :  { %815 = vadd.xlane.f32.xlu1 %v814_v45 }
 0x823   :  { %v805_v48 = vpop.permute.xlu0 %804 }
 0x824   :  { %v809_v49 = vsel %vm148_vm0, %v761_v47, %v805_v48 }
 0x825   :  { %v811_v50 = vadd.f32 %v809_v49, %v657_v14 }
 0x827   :  { %v817_v51 = vsel %vm596_vm5, %v811_v50, 0.0 }
 0x828   :  { %818 = vadd.xlane.f32.xlu0 %v817_v51 }
 0x87b   :  { %v816_v52 = vpop.xlane.xlu1 %815 }
 0x87c   :  { %v820_v53 = vmul.f32 %v816_v52, %v1431_v0 }
 0x87e   :  { %v822_v54 = vsub.f32 %v810_v44, %v820_v53 }
 0x880   :  { %v824_v55 = vmul.f32 %v822_v54, %v822_v54 }
 0x882   :  { %v826_v56 = vsel %vm596_vm5, %v824_v55, 0.0 }
 0x883   :  { %827 = vadd.xlane.f32.xlu2 %v826_v56 }
 0x89b   :  { %v819_v57 = vpop.xlane.xlu0 %818 }
 0x89c   :  { %v821_v58 = vmul.f32 %v819_v57, %v1431_v0 }
 0x89e   :  { %v823_v59 = vsub.f32 %v811_v50, %v821_v58 }
 0x8a0   :  { %v825_v60 = vmul.f32 %v823_v59, %v823_v59 }
 0x8a2   :  { %v829_v61 = vsel %vm596_vm5, %v825_v60, 0.0 }
 0x8a3   :  { %830 = vadd.xlane.f32.xlu1 %v829_v61 }
 0x8f6   :  { %v828_v62 = vpop.xlane.xlu2 %827 }
 0x8f7   :  { %v832_v63 = vmul.f32 %v828_v62, %v1431_v0 }
 0x8f9   :  { %v834_v2 = vadd.f32 1e-05, %v832_v63 }
 0x8fb   :  { %1017 = vrsqrt.f32 %v834_v2  ;;  %vm842_vm14 = vweird.f32 %v834_v2 }
 0x901   :  { %v1018_v3 = vpop.eup %1017 }
 0x902   :  { %v837_v4 = vmul.f32 %v1018_v3, %v834_v2  ;;  %vm843_vm13 = vweird.f32 %v1018_v3 }
 0x903   :  { %vm844_vm15 = vmor %vm842_vm14, %vm843_vm13 }
 0x904   :  { %v838_v5 = vmul.f32 %v1018_v3, %v837_v4 }
 0x906   :  { %v839_v6 = vmul.f32 0.5, %v838_v5 }
 0x908   :  { %v840_v7 = vsub.f32 1.5, %v839_v6 }
 0x90a   :  { %v841_v8 = vmul.f32 %v1018_v3, %v840_v7 }
 0x90c   :  { %v845_v11 = vsel %vm844_vm15, %v1018_v3, %v841_v8 }
 0x90d   :  { %v856_v14 = vmul.f32 %v845_v11, %v822_v54 }
 0x90f   :  { %v861_v15 = vmul.f32 %v993_v10, %v856_v14 }
 0x911   :  { %v866_v16 = vadd.f32 %v994_v12, %v861_v15 }
 0x913   :  { %868 = vst.msk [vmem:[#allocation13] sm:$0xff] %vm596_vm5, %v866_v16 }
 0x916   :  { %v831_v18 = vpop.xlane.xlu1 %830 }
 0x917   :  { %v833_v19 = vmul.f32 %v831_v18, %v1431_v0 }
 0x919   :  { %v835_v20 = vadd.f32 1e-05, %v833_v19 }
 0x91b   :  { %1019 = vrsqrt.f32 %v835_v20  ;;  %vm852_vm1 = vweird.f32 %v835_v20 }
 0x921   :  { %v1020_v22 = vpop.eup %1019 }
 0x922   :  { %v847_v23 = vmul.f32 %v1020_v22, %v835_v20  ;;  %vm853_vm0 = vweird.f32 %v1020_v22 }
 0x923   :  { %vm854_vm2 = vmor %vm852_vm1, %vm853_vm0 }
 0x924   :  { %v848_v24 = vmul.f32 %v1020_v22, %v847_v23 }
 0x926   :  { %v849_v25 = vmul.f32 0.5, %v848_v24 }
 0x928   :  { %v850_v26 = vsub.f32 1.5, %v849_v25 }
 0x92a   :  { %v851_v27 = vmul.f32 %v1020_v22, %v850_v26 }
 0x92c   :  { %v855_v28 = vsel %vm854_vm2, %v1020_v22, %v851_v27 }
 0x92d   :  { %v857_v29 = vmul.f32 %v855_v28, %v823_v59 }
 0x92f   :  { %v862_v0 = vmul.f32 %v993_v10, %v857_v29 }
 0x931   :  { %v867_v30 = vadd.f32 %v994_v12, %v862_v0 }
 0x933   :  { %869 = vst.msk [vmem:[#allocation13 + $0x8] sm:$0xff] %vm596_vm5, %v867_v30 }
 0x934   :  { %882 = dma.vmem_to_hbm [thread:$0]  %s875_s17, 256, %s877_s2, [#allocation6], %s1190_s24, %s1190_s24, %s1184_s1  }
 0x935   :  { %1171 = dma.done.wait [#allocation6], 256  }
 0x936   :  { %1172 = vsyncadd [#allocation6], 4294967040 }
 0x937   :  { %887 = vsyncpa [#allocation5], 1 }
 0x938   :  { %888 = vsyncpa [#allocation8], 1 }
 0x939   :  { %889 = vsyncpa [#allocation11], 1 }
 0x93a   :  { %890 = vsyncpa [#allocation6], 1 }

// kernel: tpu_custom_call.1
= control target key start
LH: loop header
LB: loop body
LE: loop exit
PB: predicated region body
PF: predicated region fallthrough
CT: control target
= control target key end

     0   :  { %s1495_s0 = inlined_call_operand.hbm [shape: f32[2,1,8], index: 0, kind: input, shape index: {}]   ;;  %s1496_s1 = inlined_call_operand.vmem [shape: f32[2,8,32], index: 1, kind: input, shape index: {}]   ;;  %s1497_s2 = inlined_call_operand.vmem [shape: bf16[16,48], index: 2, kind: input, shape index: {}]   ;;  %s1498_s3 = inlined_call_operand.vmem [shape: bf16[16,48], index: 3, kind: input, shape index: {}]   ;;  %s1499_s4 = inlined_call_operand.vmem [shape: bf16[16,16], index: 4, kind: input, shape index: {}]   ;;  %s1500_s5 = inlined_call_operand.hbm [shape: bf16[16,16], index: 5, kind: input, shape index: {}]   ;;  %s1501_s6 = inlined_call_operand.hbm [shape: bf16[16,32], index: 6, kind: input, shape index: {}]   ;;  %s1502_s7 = inlined_call_operand.vmem [shape: f32[1,32], index: 7, kind: input, shape index: {}]   ;;  %s1503_s8 = inlined_call_operand.hbm [shape: bf16[16,32], index: 8, kind: input, shape index: {}]   ;;  %s1504_s9 = inlined_call_operand.hbm [shape: f32[1,32], index: 9, kind: input, shape index: {}]   ;;  %s1505_s10 = inlined_call_operand.vmem [shape: bf16[32,16], index: 10, kind: input, shape index: {}]   ;;  %s1506_s11 = inlined_call_operand.vmem [shape: f32[1,16], index: 11, kind: input, shape index: {}]   ;;  %s1507_s12 = inlined_call_operand.vmem [shape: bf16[32,16], index: 12, kind: input, shape index: {}]   ;;  %s1508_s13 = inlined_call_operand.vmem [shape: f32[1,16], index: 13, kind: input, shape index: {}]   ;;  %s1509_s14 = inlined_call_operand.vmem [shape: f32[1,32], index: 14, kind: input, shape index: {}]   ;;  %s1510_s15 = inlined_call_operand.vmem [shape: f32[1,32], index: 15, kind: input, shape index: {}]   ;;  %s1511_s16 = inlined_call_operand.vmem [shape: f32[1,32], index: 16, kind: input, shape index: {}]   ;;  %s1512_s17 = inlined_call_operand.vmem [shape: f32[1,32], index: 17, kind: input, shape index: {}]   ;;  %s1513_s18 = inlined_call_operand.hbm [shape: f32[2,8,32], index: 18, kind: output, shape index: {}]  }
   0x1   :  { %1515 = sst [smem:[#allocation18_spill]] %s1495_s0 }
   0x2   :  { %1516 = sst [smem:[#allocation19_spill]] %s1496_s1 }
   0x3   :  { %1517 = sst [smem:[#allocation20_spill]] %s1497_s2 }
   0x4   :  { %1518 = sst [smem:[#allocation21_spill]] %s1513_s18 }
   0x5   :  { %23 = vsyncpa [#allocation5], 0 }
   0x6   :  { %24 = vsyncpa [#allocation8], 0 }
   0x7   :  { %25 = vsyncpa [#allocation11], 0  ;;  %s52_s29 = sshll.u32 %s1500_s5, 4  ;;  %s53_s29 = int_to_ptr.hbm [resolvable:$true] %s52_s29 }
   0x8   :  { %26 = vsyncpa [#allocation6], 0  ;;  %s1173_s30 = smov [#allocation7]   ;;  %s80_s20 = sshll.u32 %s1503_s8, 4  ;;  %s81_s20 = int_to_ptr.hbm [resolvable:$true] %s80_s20 }
   0x9   :  { %s54_s0 = sshll.u32 %s1173_s30, 4  ;;  %s1174_s21 = smov 64   ;;  %s55_s0 = int_to_ptr.vmem [resolvable:$true] %s54_s0 }
   0xa   :  { %s1175_s22 = smov 4   ;;  %s1176_s2 = smov [#allocation10]  }
   0xb   :  { %60 = dma.hbm_to_vmem [thread:$0]  %s53_s29, 128, %s55_s0, [#allocation8], %s1174_s21, %s1174_s21, %s1175_s22  }
   0xc   :  { %s82_s23 = sshll.u32 %s1176_s2, 4  ;;  %s1519_s26 = sld [smem:[#allocation18_spill]]  ;;  %s83_s23 = int_to_ptr.vmem [resolvable:$true] %s82_s23 }
   0xd   :  { %88 = dma.hbm_to_vmem [thread:$0]  %s81_s20, 128, %s83_s23, [#allocation11], %s1174_s21, %s1174_s21, %s1175_s22  }
   0xe   :  { %s1177_s5 = smov [#allocation4]   ;;  %s65_s8 = sshll.u32 %s1501_s6, 4  ;;  %s66_s8 = int_to_ptr.hbm [resolvable:$true] %s65_s8 }
   0xf   :  { %s33_s28 = sshll.u32 %s1177_s5, 4  ;;  %s1178_s19 = smov 16   ;;  %s34_s28 = int_to_ptr.vmem [resolvable:$true] %s33_s28 }
  0x10   :  { %s1179_s1 = smov 1   ;;  %s1180_s29 = smov [#allocation9]  }
  0x11   :  { %s67_s0 = sshll.u32 %s1180_s29, 4  ;;  %s94_s25 = sshll.u32 %s1504_s9, 4  ;;  %s68_s0 = int_to_ptr.vmem [resolvable:$true] %s67_s0  ;;  %s95_s25 = int_to_ptr.hbm [resolvable:$true] %s94_s25 }
  0x12   :  { %s31_s27 = sshll.u32 %s1519_s26, 4  ;;  %s1181_s20 = smov [#allocation12]   ;;  %s32_s27 = int_to_ptr.hbm [resolvable:$true] %s31_s27 }
  0x13   :  { %39 = dma.hbm_to_vmem [thread:$0]  %s32_s27, 32, %s34_s28, [#allocation5], %s1178_s19, %s1178_s19, %s1179_s1  }
  0x14   :  { %73 = dma.hbm_to_vmem [thread:$0]  %s66_s8, 128, %s68_s0, [#allocation8], %s1174_s21, %s1174_s21, %s1175_s22  }
  0x15   :  { %s96_s23 = sshll.u32 %s1181_s20, 4  ;;  %s97_s23 = int_to_ptr.vmem [resolvable:$true] %s96_s23 }
  0x16   :  { %99 = dma.hbm_to_vmem [thread:$0]  %s95_s25, 16, %s97_s23, [#allocation11]  }
  0x17   :  { %1165 = dma.done.wait [#allocation5], 32  }
  0x18   :  { %1166 = vsyncadd [#allocation5], 4294967264 }
  0x19   :  { %1167 = dma.done.wait [#allocation8], 256  }
  0x1a   :  { %1168 = vsyncadd [#allocation8], 4294967040 }
  0x1b   :  { %1169 = dma.done.wait [#allocation11], 144  }
  0x1c   :  { %1170 = vsyncadd [#allocation11], 4294967152  ;;  %s1520_s26 = sld [smem:[#allocation19_spill]]  ;;  %vm148_vm0 = vcmask 130048   ;;  %v958_v4 = vld [vmem:[%s1498_s3] sm:$0xff]  ;;  %s1182_s8 = smov 112  }
  0x1d   :  { %s1521_s5 = sld [smem:[#allocation20_spill]]  ;;  %189 = vmatpush.bf16.msra.mxu1 %v958_v4  ;;  %s1183_s3 = smov 120   ;;  %vm214_vm1 = vcmask 64512   ;;  %v198_v46 = vld [vmem:[#allocation4] sm:$0x1]  ;;  %vm322_vm2 = vcmask 1043456  }
  0x1e   :  { %s1184_s1 = smov 8   ;;  %s1185_s29 = smov 104   ;;  %v199_v47 = vld [vmem:[#allocation4 + $0x1] sm:$0x1]  ;;  %v901_v48 = vadd.f32 -1.0, %v198_v46  ;;  %vm358_vm3 = vcmask 60416  }
  0x1f   :  { %s1186_s0 = smov 96   ;;  %v902_v49 = vadd.f32 -1.0, %v199_v47  ;;  %s1187_s2 = smov 88   ;;  %vm513_vm4 = vcmask 126016   ;;  %vm596_vm5 = vcmask 261120  }
  0x20   :  { %v202_v50 = vmul.f32 1e+30, %v901_v48  ;;  %s1190_s24 = smov 128  }
  0x21   :  { %v203_v51 = vmul.f32 1e+30, %v902_v49 }
  0x22   :  { %v1306_v0 = vld [vmem:[%s1520_s26] sm:$0xff]  ;;  %v1311_v1 = vld [vmem:[%s1520_s26 + $0x8] sm:$0xff]  ;;  %v257_v52 = vperm.slane %v202_v50, 0 }
  0x23   :  { %v957_v2 = vld [vmem:[%s1521_s5] sm:$0xff]  ;;  %v139_v3 = vpack.c.bf16 %v1311_v1, %v1306_v0  ;;  %v258_v53 = vperm.slane %v203_v51, 0 }
  0x24   :  { %159 = vmatpush.bf16.msra.mxu0 %v957_v2 }
  0x25   :  { %171 = vrot.lane.b32.xlu0 %v139_v3, %s1182_s8 }
  0x27   :  { %895 = vmatmul.msk.bf16.vlgmr.msra.gmra.mxu0 %vm148_vm0, %v139_v3 }
  0x97   :  { %v172_v5 = vpop.permute.xlu0 %171 }
  0x98   :  { %900 = vmatmul.msk.bf16.vlgmr.msra.gmra.mxu1 %vm148_vm0, %v172_v5 }
  0xa4   :  { %v161_v6 = vpop.f32.mrf.mxu0 }
  0xa5   :  { %v166_v7 = vpack.c.bf16 %v161_v6, %v161_v6 }
  0xa7   :  { %v223_v8 = vunpack.c.l.b16 %v166_v7 }
  0xa9   :  { %v1324_v9 = vpack.c.b16 %v223_v8, %v223_v8 }
  0xab   :  { %227 = vrot.lane.b32.xlu0 %v1324_v9, %s1182_s8 }
  0xac   :  { %v163_v10 = vpop.f32.mrf.mxu0 }
  0xad   :  { %v167_v11 = vpack.c.bf16 %v163_v10, %v163_v10 }
  0xaf   :  { %v224_v12 = vunpack.c.l.b16 %v167_v11 }
  0xb1   :  { %v1328_v13 = vpack.c.b16 %v224_v12, %v224_v12 }
  0xb3   :  { %229 = vrot.lane.b32.xlu1 %v1328_v13, %s1182_s8 }
 0x115   :  { %v191_v14 = vpop.f32.mrf.mxu1 }
 0x116   :  { %v196_v15 = vpack.c.bf16 %v191_v14, %v191_v14 }
 0x118   :  { %v206_v16 = vunpack.c.l.b16 %v196_v15 }
 0x11a   :  { %v1332_v17 = vpack.c.b16 %v206_v16, %v206_v16 }
 0x11c   :  { %231 = vrot.lane.b32.xlu1 %v1332_v17, %s1183_s3 }
 0x11d   :  { %v193_v18 = vpop.f32.mrf.mxu1  ;;  %v228_v26 = vpop.permute.xlu0 %227 }
 0x11e   :  { %v197_v19 = vpack.c.bf16 %v193_v18, %v193_v18 }
 0x120   :  { %v207_v20 = vunpack.c.l.b16 %v197_v19 }
 0x122   :  { %v1336_v21 = vpack.c.b16 %v207_v20, %v207_v20 }
 0x124   :  { %233 = vrot.lane.b32.xlu2 %v1336_v21, %s1183_s3  ;;  %212 = vrot.lane.b32.xlu0 %v1336_v21, %s1184_s1 }
 0x125   :  { %381 = vrot.lane.b32.xlu1 %v1324_v9, %s1185_s29  ;;  %v230_v22 = vpop.permute.xlu1 %229 }
 0x12c   :  { %210 = vrot.lane.b32.xlu2 %v1332_v17, %s1184_s1  ;;  %385 = vrot.lane.b32.xlu0 %v1332_v17, %s1182_s8 }
 0x12d   :  { %387 = vrot.lane.b32.xlu1 %v1336_v21, %s1182_s8 }
 0x134   :  { %373 = vrot.lane.b32.xlu0 %v1328_v13, %s1183_s3  ;;  %383 = vrot.lane.b32.xlu2 %v1328_v13, %s1185_s29 }
 0x13c   :  { %241 = vrot.lane.b32.xlu0 %v1324_v9, %s1186_s0  ;;  %371 = vrot.lane.b32.xlu2 %v1324_v9, %s1183_s3 }
 0x17e   :  { %v234_v23 = vpop.permute.xlu2 %233 }
 0x17f   :  { %v240_v24 = vsel %vm214_vm1, %v230_v22, %v234_v23 }
 0x180   :  { %v280_v25 = vsel %vm148_vm0, %v240_v24, 0 }
 0x181   :  { %289 = vmatpush.bf16.xpose.msra.mxu3 %v280_v25 }
 0x186   :  { %v211_v29 = vpop.permute.xlu2 %210 }
 0x187   :  { %v217_v33 = vsel %vm214_vm1, %v166_v7, %v211_v29 }
 0x18e   :  { %v232_v27 = vpop.permute.xlu1 %231  ;;  %v384_v35 = vpop.permute.xlu2 %383 }
 0x18f   :  { %v237_v28 = vsel %vm214_vm1, %v228_v26, %v232_v27 }
 0x190   :  { %v263_v30 = vsel %vm148_vm0, %v237_v28, 0 }
 0x191   :  { %272 = vmatpush.bf16.xpose.msra.mxu2 %v263_v30 }
 0x196   :  { %v213_v31 = vpop.permute.xlu0 %212  ;;  %v372_v42 = vpop.permute.xlu2 %371 }
 0x197   :  { %v382_v32 = vpop.permute.xlu1 %381  ;;  %v220_v34 = vsel %vm214_vm1, %v167_v11, %v213_v31  ;;  %v377_v44 = vsel %vm214_vm1, %v372_v42, %v196_v15 }
 0x198   :  { %903 = vmatmul.msk.bf16.vlgmr.msra.gmra.mxu2 %vm148_vm0, %v217_v33  ;;  %904 = vmatmul.msk.bf16.vlgmr.msra.gmra.mxu3 %vm148_vm0, %v220_v34 }
 0x19e   :  { %v386_v36 = vpop.permute.xlu0 %385 }
 0x19f   :  { %v388_v37 = vpop.permute.xlu1 %387  ;;  %v391_v38 = vsel %vm214_vm1, %v382_v32, %v386_v36 }
 0x1a0   :  { %v411_v39 = vsel %vm148_vm0, %v391_v38, 0  ;;  %v394_v40 = vsel %vm214_vm1, %v384_v35, %v388_v37 }
 0x1a1   :  { %420 = vmatpush.bf16.xpose.msrb.mxu2 %v411_v39  ;;  %v428_v41 = vsel %vm148_vm0, %v394_v40, 0 }
 0x1a2   :  { %437 = vmatpush.bf16.xpose.msrb.mxu3 %v428_v41 }
 0x1a6   :  { %v374_v43 = vpop.permute.xlu0 %373 }
 0x1a7   :  { %v380_v45 = vsel %vm214_vm1, %v374_v43, %v197_v19 }
 0x1a8   :  { %907 = vmatmul.msk.bf16.vlgmr.msrb.gmra.mxu2 %vm148_vm0, %v377_v44 }
 0x1a9   :  { %908 = vmatmul.msk.bf16.vlgmr.msrb.gmra.mxu3 %vm148_vm0, %v380_v45 }
 0x1ae   :  { %v242_v25 = vpop.permute.xlu0 %241 }
 0x21b   :  { %v274_v54 = vpop.f32.mrf.mxu2  ;;  %v291_v55 = vpop.f32.mrf.mxu3 }
 0x21c   :  { %v275_v56 = vadd.f32 %v274_v54, %v257_v52  ;;  %v292_v57 = vadd.f32 %v291_v55, %v258_v53 }
 0x21e   :  { %v295_v58 = vsel %vm214_vm1, %v275_v56, -inf  ;;  %v298_v59 = vsel %vm214_vm1, %v292_v57, -inf }
 0x21f   :  { %296 = vmax.xlane.f32.xlu1 %v295_v58  ;;  %299 = vmax.xlane.f32.xlu2 %v298_v59 }
 0x223   :  { %v276_v60 = vpop.f32.mrf.mxu2  ;;  %v293_v61 = vpop.f32.mrf.mxu3 }
 0x22b   :  { %v422_v62 = vpop.f32.mrf.mxu2 }
 0x22c   :  { %v423_v63 = vadd.f32 %v422_v62, %v257_v52  ;;  %v439_v2 = vpop.f32.mrf.mxu3 }
 0x22d   :  { %v440_v3 = vadd.f32 %v439_v2, %v258_v53 }
 0x22e   :  { %v443_v4 = vsel %vm214_vm1, %v423_v63, -inf }
 0x22f   :  { %444 = vmax.xlane.f32.xlu0 %v443_v4  ;;  %v446_v5 = vsel %vm214_vm1, %v440_v3, -inf }
 0x230   :  { %447 = vmax.xlane.f32.xlu2 %v446_v5 }
 0x233   :  { %v424_v6 = vpop.f32.mrf.mxu2 }
 0x234   :  { %v441_v7 = vpop.f32.mrf.mxu3 }
 0x243   :  { %247 = vrot.lane.b32.xlu0 %v1336_v21, %s1185_s29 }
 0x248   :  { %245 = vrot.lane.b32.xlu2 %v1332_v17, %s1185_s29 }
 0x292   :  { %v297_v8 = vpop.xlane.xlu1 %296  ;;  %v300_v10 = vpop.xlane.xlu2 %299 }
 0x293   :  { %v301_v11 = vsub.f32 %v275_v56, %v297_v8  ;;  %v302_v12 = vsub.f32 %v292_v57, %v300_v10 }
 0x295   :  { %v303_v14 = vmul.f32 1.442695, %v301_v11  ;;  %v305_v15 = vmul.f32 1.442695, %v302_v12  ;;  %v962_v12 = vld [vmem:[#allocation7] sm:$0xff] }
 0x296   :  { %575 = vmatpush.bf16.msra.mxu3 %v962_v12 }
 0x297   :  { %995 = vpow2.f32 %v303_v14 }
 0x298   :  { %997 = vpow2.f32 %v305_v15 }
 0x29d   :  { %v996_v16 = vpop.eup %995 }
 0x29e   :  { %v998_v18 = vpop.eup %997  ;;  %v307_v19 = vsel %vm214_vm1, %v996_v16, 0.0 }
 0x29f   :  { %308 = vadd.xlane.f32.xlu1 %v307_v19  ;;  %v310_v20 = vsel %vm214_vm1, %v998_v18, 0.0 }
 0x2a0   :  { %311 = vadd.xlane.f32.xlu2 %v310_v20 }
 0x2a2   :  { %v445_v31 = vpop.xlane.xlu0 %444 }
 0x2a3   :  { %v448_v22 = vpop.xlane.xlu2 %447  ;;  %v449_v32 = vsub.f32 %v423_v63, %v445_v31 }
 0x2a4   :  { %v450_v23 = vsub.f32 %v440_v3, %v448_v22 }
 0x2a5   :  { %v451_v33 = vmul.f32 1.442695, %v449_v32 }
 0x2a6   :  { %v453_v24 = vmul.f32 1.442695, %v450_v23 }
 0x2a8   :  { %999 = vpow2.f32 %v453_v24 }
 0x2a9   :  { %1001 = vpow2.f32 %v451_v33 }
 0x2ab   :  { %v246_v26 = vpop.permute.xlu2 %245 }
 0x2ac   :  { %v251_v27 = vsel %vm214_vm1, %v242_v25, %v246_v26 }
 0x2ad   :  { %v323_v28 = vsel %vm322_vm2, %v251_v27, 0 }
 0x2ae   :  { %v1000_v29 = vpop.eup %999  ;;  %332 = vmatpush.bf16.msrb.mxu0 %v323_v28 }
 0x2af   :  { %v458_v30 = vsel %vm214_vm1, %v1000_v29, 0.0  ;;  %v1002_v34 = vpop.eup %1001 }
 0x2b0   :  { %459 = vadd.xlane.f32.xlu0 %v458_v30  ;;  %v455_v35 = vsel %vm214_vm1, %v1002_v34, 0.0 }
 0x2b5   :  { %v248_v40 = vpop.permute.xlu0 %247 }
 0x2b8   :  { %395 = vrot.lane.b32.xlu2 %v1324_v9, %s1187_s2  ;;  %243 = vrot.lane.b32.xlu1 %v1328_v13, %s1186_s0 }
 0x2c0   :  { %397 = vrot.lane.b32.xlu2 %v1328_v13, %s1187_s2 }
 0x2c8   :  { %399 = vrot.lane.b32.xlu2 %v1332_v17, %s1186_s0 }
 0x2d0   :  { %401 = vrot.lane.b32.xlu2 %v1336_v21, %s1186_s0  ;;  %s1522_s0 = sld [smem:[#allocation21_spill]] }
 0x2d6   :  { %s876_s2 = sshll.u32 %s1522_s0, 4  ;;  %s877_s2 = int_to_ptr.hbm [resolvable:$true] %s876_s2 }
 0x2e2   :  { %456 = vadd.xlane.f32.xlu1 %v455_v35 }
 0x312   :  { %v309_v9 = vpop.xlane.xlu1 %308 }
 0x313   :  { %1003 = vrcp.f32 %v309_v9  ;;  %v312_v36 = vpop.xlane.xlu2 %311 }
 0x314   :  { %1005 = vrcp.f32 %v312_v36 }
 0x319   :  { %v1004_v37 = vpop.eup %1003 }
 0x31a   :  { %v315_v38 = vmul.f32 %v1004_v37, %v996_v16  ;;  %v1006_v41 = vpop.eup %1005 }
 0x31b   :  { %v396_v13 = vpop.permute.xlu2 %395  ;;  %v316_v21 = vmul.f32 %v1006_v41, %v998_v18  ;;  %v961_v18 = vld [vmem:[%s1499_s4] sm:$0xff] }
 0x31c   :  { %v317_v39 = vpack.c.bf16 %v315_v38, %v315_v38  ;;  %545 = vmatpush.bf16.msra.mxu2 %v961_v18  ;;  %v965_v18 = vld [vmem:[%s1505_s10] sm:$0xff] }
 0x31d   :  { %v318_v49 = vpack.c.bf16 %v316_v21, %v316_v21 }
 0x31e   :  { %905 = vmatmul.msk.bf16.vlgmr.msrb.gmra.mxu0 %vm214_vm1, %v317_v39 }
 0x323   :  { %v398_v17 = vpop.permute.xlu2 %397  ;;  %v460_v48 = vpop.xlane.xlu0 %459 }
 0x324   :  { %1007 = vrcp.f32 %v460_v48 }
 0x32a   :  { %v244_v42 = vpop.permute.xlu1 %243  ;;  %v1008_v53 = vpop.eup %1007 }
 0x32b   :  { %v400_v43 = vpop.permute.xlu2 %399  ;;  %v254_v44 = vsel %vm214_vm1, %v244_v42, %v248_v40  ;;  %v464_v54 = vmul.f32 %v1008_v53, %v1000_v29 }
 0x32c   :  { %v405_v45 = vsel %vm214_vm1, %v396_v13, %v400_v43  ;;  %v341_v46 = vsel %vm322_vm2, %v254_v44, 0 }
 0x32d   :  { %v470_v47 = vsel %vm322_vm2, %v405_v45, 0  ;;  %350 = vmatpush.bf16.msrb.mxu1 %v341_v46  ;;  %v466_v55 = vpack.c.bf16 %v464_v54, %v464_v54  ;;  %v963_v45 = vld [vmem:[#allocation9] sm:$0xff] }
 0x32e   :  { %479 = vmatpush.bf16.msra.mxu0 %v470_v47 }
 0x330   :  { %906 = vmatmul.msk.bf16.vlgmr.msrb.gmra.mxu1 %vm214_vm1, %v318_v49  ;;  %v964_v49 = vld [vmem:[#allocation10] sm:$0xff] }
 0x332   :  { %681 = vmatpush.bf16.msrb.mxu0 %v963_v45 }
 0x333   :  { %v402_v50 = vpop.permute.xlu2 %401 }
 0x334   :  { %v408_v51 = vsel %vm214_vm1, %v398_v17, %v402_v50 }
 0x335   :  { %v488_v52 = vsel %vm322_vm2, %v408_v51, 0 }
 0x336   :  { %497 = vmatpush.bf16.msra.mxu1 %v488_v52 }
 0x33a   :  { %716 = vmatpush.bf16.msrb.mxu1 %v964_v49 }
 0x340   :  { %910 = vmatmul.msk.bf16.vlgmr.msra.gmra.mxu1 %vm214_vm1, %v466_v55 }
 0x355   :  { %v457_v56 = vpop.xlane.xlu1 %456 }
 0x356   :  { %1009 = vrcp.f32 %v457_v56 }
 0x35c   :  { %v1010_v57 = vpop.eup %1009 }
 0x35d   :  { %v463_v58 = vmul.f32 %v1010_v57, %v1002_v34  ;;  %v1188_v34 = vmov 32.0  }
 0x35e   :  { %1011 = vrcp.f32 %v1188_v34 }
 0x35f   :  { %v465_v59 = vpack.c.bf16 %v463_v58, %v463_v58 }
 0x361   :  { %909 = vmatmul.msk.bf16.vlgmr.msra.gmra.mxu0 %vm214_vm1, %v465_v59 }
 0x364   :  { %v1012_v35 = vpop.eup %1011 }
 0x365   :  { %v604_v9 = vmul.f32 32.0, %v1012_v35  ;;  %vm608_vm6 = vweird.f32 %v1012_v35 }
 0x367   :  { %v605_v36 = vsub.f32 1.0, %v604_v9 }
 0x369   :  { %v606_v37 = vmul.f32 %v1012_v35, %v605_v36 }
 0x36b   :  { %v607_v38 = vadd.f32 %v1012_v35, %v606_v37 }
 0x39b   :  { %v334_v60 = vpop.f32.mrf.mxu0 }
 0x39c   :  { %v356_v61 = vpack.c.bf16 %v334_v60, %v334_v60 }
 0x39e   :  { %359 = vst.msk [vmem:[#allocation2] sm:$0xf] %vm358_vm3, %v356_v61  ;;  %363 = vrot.lane.b32.xlu2 %v356_v61, %s1183_s3 }
 0x3a3   :  { %v336_v62 = vpop.f32.mrf.mxu0 }
 0x3ad   :  { %v352_v63 = vpop.f32.mrf.mxu1 }
 0x3ae   :  { %v357_v2 = vpack.c.bf16 %v352_v63, %v352_v63 }
 0x3b0   :  { %360 = vst.msk [vmem:[#allocation2 + $0x4] sm:$0xf] %vm358_vm3, %v357_v2  ;;  %365 = vrot.lane.b32.xlu1 %v357_v2, %s1183_s3 }
 0x3b5   :  { %v354_v3 = vpop.f32.mrf.mxu1 }
 0x3bd   :  { %v499_v4 = vpop.f32.mrf.mxu1 }
 0x3be   :  { %v504_v5 = vpack.c.bf16 %v499_v4, %v499_v4  ;;  %v987_v4 = vld [vmem:[%s1509_s14] ss:$0 sm:$0xff] }
 0x3c0   :  { %509 = vrot.lane.b32.xlu2 %v504_v5, %s1184_s1 }
 0x3c5   :  { %v501_v6 = vpop.f32.mrf.mxu1 }
 0x3de   :  { %v481_v7 = vpop.f32.mrf.mxu0 }
 0x3df   :  { %v503_v8 = vpack.c.bf16 %v481_v7, %v481_v7 }
 0x3e1   :  { %507 = vrot.lane.b32.xlu0 %v503_v8, %s1184_s1 }
 0x3e6   :  { %v483_v10 = vpop.f32.mrf.mxu0 }
 0x3e7   :  { %v988_v10 = vld [vmem:[%s1510_s15] ss:$0 sm:$0xff] }
 0x3f8   :  { %v364_v11 = vpop.permute.xlu2 %363 }
 0x3f9   :  { %369 = vst.msk [vmem:[#allocation3] sm:$0xf] %vm358_vm3, %v364_v11 }
 0x3fa   :  { %516 = vst.msk [vmem:[#allocation3] sm:$0xf] %vm513_vm4, %v503_v8 }
 0x41a   :  { %v510_v14 = vpop.permute.xlu2 %509 }
 0x41b   :  { %515 = vst.msk [vmem:[#allocation2 + $0x4] sm:$0xf] %vm513_vm4, %v510_v14 }
 0x422   :  { %v366_v15 = vpop.permute.xlu1 %365 }
 0x423   :  { %370 = vst.msk [vmem:[#allocation3 + $0x4] sm:$0xf] %vm358_vm3, %v366_v15 }
 0x424   :  { %517 = vst.msk [vmem:[#allocation3 + $0x4] sm:$0xf] %vm513_vm4, %v504_v5 }
 0x42b   :  { %v960_v16 = vld [vmem:[#allocation3] sm:$0xff] }
 0x42c   :  { %928 = vmatmul.msk.bf16.vlgmr.msra.gmra.mxu3 %vm148_vm0, %v960_v16  ;;  %v966_v16 = vld [vmem:[%s1505_s10 + $0x8] sm:$0xff] }
 0x42d   :  { %755 = vmatpush.bf16.msrb.mxu2 %v966_v16 }
 0x431   :  { %756 = vmatpush.bf16.msrb.mxu2 %v965_v18 }
 0x453   :  { %v508_v19 = vpop.permute.xlu0 %507 }
 0x454   :  { %514 = vst.msk [vmem:[#allocation2] sm:$0xf] %vm513_vm4, %v508_v19 }
 0x45b   :  { %v959_v20 = vld [vmem:[#allocation2] sm:$0xff] }
 0x45c   :  { %919 = vmatmul.msk.bf16.vlgmr.msra.gmra.mxu2 %vm148_vm0, %v959_v20 }
 0x4af   :  { %v577_v22 = vpop.f32.mrf.mxu3 }
 0x4b0   :  { %584 = vrot.lane.b32.xlu2 %v577_v22, %s1178_s19  ;;  %v989_v22 = vld [vmem:[%s1502_s7] ss:$0 sm:$0xff] }
 0x4b7   :  { %v579_v23 = vpop.f32.mrf.mxu3 }
 0x4b8   :  { %586 = vrot.lane.b32.xlu2 %v579_v23, %s1178_s19 }
 0x4df   :  { %v547_v24 = vpop.f32.mrf.mxu2 }
 0x4e7   :  { %v549_v29 = vpop.f32.mrf.mxu2 }
 0x50a   :  { %v585_v25 = vpop.permute.xlu2 %584 }
 0x50b   :  { %v590_v26 = vsel %vm148_vm0, %v547_v24, %v585_v25 }
 0x50c   :  { %v592_v27 = vadd.f32 %v590_v26, %v1306_v0  ;;  %v1431_v0 = vsel %vm608_vm6, %v1012_v35, %v607_v38  ;;  %v992_v38 = vld [vmem:[%s1508_s13] ss:$0 sm:$0xff] }
 0x50e   :  { %v597_v28 = vsel %vm596_vm5, %v592_v27, 0.0 }
 0x50f   :  { %598 = vadd.xlane.f32.xlu0 %v597_v28 }
 0x512   :  { %v587_v30 = vpop.permute.xlu2 %586 }
 0x513   :  { %v591_v31 = vsel %vm148_vm0, %v549_v29, %v587_v30  ;;  %v968_v29 = vld [vmem:[%s1507_s12 + $0x8] sm:$0xff]  ;;  %v967_v30 = vld [vmem:[%s1507_s12] sm:$0xff] }
 0x514   :  { %v593_v32 = vadd.f32 %v591_v31, %v1311_v1  ;;  %792 = vmatpush.bf16.msrb.mxu3 %v968_v29 }
 0x516   :  { %v600_v33 = vsel %vm596_vm5, %v593_v32, 0.0 }
 0x517   :  { %601 = vadd.xlane.f32.xlu1 %v600_v33 }
 0x518   :  { %793 = vmatpush.bf16.msrb.mxu3 %v967_v30 }
 0x582   :  { %v599_v13 = vpop.xlane.xlu0 %598 }
 0x583   :  { %v610_v39 = vmul.f32 %v1431_v0, %v599_v13 }
 0x585   :  { %v612_v17 = vsub.f32 %v592_v27, %v610_v39 }
 0x587   :  { %v614_v40 = vmul.f32 %v612_v17, %v612_v17 }
 0x589   :  { %v616_v1 = vsel %vm596_vm5, %v614_v40, 0.0 }
 0x58a   :  { %617 = vadd.xlane.f32.xlu2 %v616_v1  ;;  %v602_v41 = vpop.xlane.xlu1 %601  ;;  %v991_v1 = vld [vmem:[%s1506_s11] ss:$0 sm:$0xff] }
 0x58b   :  { %v611_v21 = vmul.f32 %v1431_v0, %v602_v41 }
 0x58d   :  { %v613_v42 = vsub.f32 %v593_v32, %v611_v21  ;;  %v990_v32 = vld [vmem:[#allocation12] ss:$0 sm:$0xff] }
 0x58f   :  { %v615_v43 = vmul.f32 %v613_v42, %v613_v42 }
 0x591   :  { %v619_v44 = vsel %vm596_vm5, %v615_v43, 0.0 }
 0x592   :  { %620 = vadd.xlane.f32.xlu0 %v619_v44 }
 0x5fd   :  { %v618_v46 = vpop.xlane.xlu2 %617 }
 0x5fe   :  { %v622_v47 = vmul.f32 %v618_v46, %v1431_v0 }
 0x600   :  { %v624_v48 = vadd.f32 1e-05, %v622_v47 }
 0x602   :  { %1013 = vrsqrt.f32 %v624_v48  ;;  %vm632_vm8 = vweird.f32 %v624_v48 }
 0x605   :  { %v621_v50 = vpop.xlane.xlu0 %620 }
 0x606   :  { %v623_v51 = vmul.f32 %v621_v50, %v1431_v0 }
 0x608   :  { %v1014_v52 = vpop.eup %1013  ;;  %v625_v53 = vadd.f32 1e-05, %v623_v51 }
 0x609   :  { %v627_v54 = vmul.f32 %v1014_v52, %v624_v48  ;;  %vm633_vm7 = vweird.f32 %v1014_v52 }
 0x60a   :  { %1015 = vrsqrt.f32 %v625_v53  ;;  %vm634_vm9 = vmor %vm632_vm8, %vm633_vm7  ;;  %vm642_vm11 = vweird.f32 %v625_v53 }
 0x60b   :  { %v628_v55 = vmul.f32 %v1014_v52, %v627_v54 }
 0x60d   :  { %v629_v56 = vmul.f32 0.5, %v628_v55 }
 0x60f   :  { %v630_v57 = vsub.f32 1.5, %v629_v56 }
 0x610   :  { %v1016_v58 = vpop.eup %1015 }
 0x611   :  { %v631_v59 = vmul.f32 %v1014_v52, %v630_v57  ;;  %v637_v60 = vmul.f32 %v1016_v58, %v625_v53  ;;  %vm643_vm10 = vweird.f32 %v1016_v58 }
 0x612   :  { %vm644_vm12 = vmor %vm642_vm11, %vm643_vm10 }
 0x613   :  { %v638_v61 = vmul.f32 %v1016_v58, %v637_v60  ;;  %v635_v62 = vsel %vm634_vm9, %v1014_v52, %v631_v59 }
 0x614   :  { %v646_v3 = vmul.f32 %v635_v62, %v612_v17 }
 0x615   :  { %v639_v63 = vmul.f32 0.5, %v638_v61 }
 0x616   :  { %v651_v8 = vmul.f32 %v987_v4, %v646_v3 }
 0x617   :  { %v640_v2 = vsub.f32 1.5, %v639_v63 }
 0x618   :  { %v656_v12 = vadd.f32 %v988_v10, %v651_v8 }
 0x619   :  { %v641_v5 = vmul.f32 %v1016_v58, %v640_v2 }
 0x61b   :  { %v645_v6 = vsel %vm644_vm12, %v1016_v58, %v641_v5 }
 0x61c   :  { %v647_v7 = vmul.f32 %v645_v6, %v613_v42 }
 0x61e   :  { %v652_v11 = vmul.f32 %v987_v4, %v647_v7 }
 0x620   :  { %v657_v14 = vadd.f32 %v988_v10, %v652_v11  ;;  %v993_v10 = vld [vmem:[%s1511_s16] ss:$0 sm:$0xff]  ;;  %s1189_s16 = smov [#allocation13]  }
 0x622   :  { %v658_v15 = vpack.c.bf16 %v657_v14, %v656_v12 }
 0x624   :  { %698 = vrot.lane.b32.xlu1 %v658_v15, %s1182_s8  ;;  %933 = vmatmul.msk.bf16.vlgmr.msrb.gmra.mxu0 %vm148_vm0, %v658_v15 }
 0x696   :  { %v699_v19 = vpop.permute.xlu1 %698 }
 0x697   :  { %938 = vmatmul.msk.bf16.vlgmr.msrb.gmra.mxu1 %vm148_vm0, %v699_v19 }
 0x6a1   :  { %v683_v20 = vpop.f32.mrf.mxu0 }
 0x6a2   :  { %v684_v23 = vadd.f32 %v989_v22, %v683_v20 }
 0x6a4   :  { %v688_v26 = vmax.f32 %v684_v23, 0.0 }
 0x6a9   :  { %v685_v24 = vpop.f32.mrf.mxu0 }
 0x6aa   :  { %v686_v25 = vadd.f32 %v989_v22, %v685_v24 }
 0x6ac   :  { %v689_v27 = vmax.f32 %v686_v25, 0.0 }
 0x6ae   :  { %v690_v28 = vpack.c.bf16 %v689_v27, %v688_v26 }
 0x6b0   :  { %947 = vmatmul.msk.bf16.vlgmr.msrb.gmra.mxu2 %vm596_vm5, %v690_v28 }
 0x714   :  { %v718_v31 = vpop.f32.mrf.mxu1 }
 0x715   :  { %v719_v33 = vadd.f32 %v990_v32, %v718_v31 }
 0x717   :  { %v723_v9 = vmax.f32 %v719_v33, 0.0 }
 0x71c   :  { %v720_v34 = vpop.f32.mrf.mxu1 }
 0x71d   :  { %v721_v35 = vadd.f32 %v990_v32, %v720_v34 }
 0x71f   :  { %v724_v36 = vmax.f32 %v721_v35, 0.0 }
 0x721   :  { %v725_v37 = vpack.c.bf16 %v724_v36, %v723_v9 }
 0x723   :  { %956 = vmatmul.msk.bf16.vlgmr.msrb.gmra.mxu3 %vm596_vm5, %v725_v37 }
 0x733   :  { %v758_v41 = vpop.f32.mrf.mxu2 }
 0x734   :  { %v759_v21 = vadd.f32 %v991_v1, %v758_v41 }
 0x73b   :  { %v760_v46 = vpop.f32.mrf.mxu2 }
 0x73c   :  { %v761_v47 = vadd.f32 %v991_v1, %v760_v46 }
 0x7a6   :  { %v795_v13 = vpop.f32.mrf.mxu3 }
 0x7a7   :  { %v796_v39 = vadd.f32 %v992_v38, %v795_v13 }
 0x7a9   :  { %802 = vrot.lane.b32.xlu2 %v796_v39, %s1178_s19 }
 0x7ae   :  { %v797_v17 = vpop.f32.mrf.mxu3 }
 0x7af   :  { %v798_v40 = vadd.f32 %v992_v38, %v797_v17 }
 0x7b1   :  { %804 = vrot.lane.b32.xlu0 %v798_v40, %s1178_s19 }
 0x803   :  { %v803_v42 = vpop.permute.xlu2 %802 }
 0x804   :  { %v808_v43 = vsel %vm148_vm0, %v759_v21, %v803_v42 }
 0x805   :  { %v810_v44 = vadd.f32 %v808_v43, %v656_v12  ;;  %v994_v12 = vld [vmem:[%s1512_s17] ss:$0 sm:$0xff]  ;;  %s874_s17 = sshll.u32 %s1189_s16, 4  ;;  %s875_s17 = int_to_ptr.vmem [resolvable:$true] %s874_s17 }
 0x807   :  { %v814_v45 = vsel %vm596_vm5, %v810_v44, 0.0 }
 0x808   :  { %815 = vadd.xlane.f32.xlu1 %v814_v45 }
 0x823   :  { %v805_v48 = vpop.permute.xlu0 %804 }
 0x824   :  { %v809_v49 = vsel %vm148_vm0, %v761_v47, %v805_v48 }
 0x825   :  { %v811_v50 = vadd.f32 %v809_v49, %v657_v14 }
 0x827   :  { %v817_v51 = vsel %vm596_vm5, %v811_v50, 0.0 }
 0x828   :  { %818 = vadd.xlane.f32.xlu0 %v817_v51 }
 0x87b   :  { %v816_v52 = vpop.xlane.xlu1 %815 }
 0x87c   :  { %v820_v53 = vmul.f32 %v816_v52, %v1431_v0 }
 0x87e   :  { %v822_v54 = vsub.f32 %v810_v44, %v820_v53 }
 0x880   :  { %v824_v55 = vmul.f32 %v822_v54, %v822_v54 }
 0x882   :  { %v826_v56 = vsel %vm596_vm5, %v824_v55, 0.0 }
 0x883   :  { %827 = vadd.xlane.f32.xlu2 %v826_v56 }
 0x89b   :  { %v819_v57 = vpop.xlane.xlu0 %818 }
 0x89c   :  { %v821_v58 = vmul.f32 %v819_v57, %v1431_v0 }
 0x89e   :  { %v823_v59 = vsub.f32 %v811_v50, %v821_v58 }
 0x8a0   :  { %v825_v60 = vmul.f32 %v823_v59, %v823_v59 }
 0x8a2   :  { %v829_v61 = vsel %vm596_vm5, %v825_v60, 0.0 }
 0x8a3   :  { %830 = vadd.xlane.f32.xlu1 %v829_v61 }
 0x8f6   :  { %v828_v62 = vpop.xlane.xlu2 %827 }
 0x8f7   :  { %v832_v63 = vmul.f32 %v828_v62, %v1431_v0 }
 0x8f9   :  { %v834_v2 = vadd.f32 1e-05, %v832_v63 }
 0x8fb   :  { %1017 = vrsqrt.f32 %v834_v2  ;;  %vm842_vm14 = vweird.f32 %v834_v2 }
 0x901   :  { %v1018_v3 = vpop.eup %1017 }
 0x902   :  { %v837_v4 = vmul.f32 %v1018_v3, %v834_v2  ;;  %vm843_vm13 = vweird.f32 %v1018_v3 }
 0x903   :  { %vm844_vm15 = vmor %vm842_vm14, %vm843_vm13 }
 0x904   :  { %v838_v5 = vmul.f32 %v1018_v3, %v837_v4 }
 0x906   :  { %v839_v6 = vmul.f32 0.5, %v838_v5 }
 0x908   :  { %v840_v7 = vsub.f32 1.5, %v839_v6 }
 0x90a   :  { %v841_v8 = vmul.f32 %v1018_v3, %v840_v7 }
 0x90c   :  { %v845_v11 = vsel %vm844_vm15, %v1018_v3, %v841_v8 }
 0x90d   :  { %v856_v14 = vmul.f32 %v845_v11, %v822_v54 }
 0x90f   :  { %v861_v15 = vmul.f32 %v993_v10, %v856_v14 }
 0x911   :  { %v866_v16 = vadd.f32 %v994_v12, %v861_v15 }
 0x913   :  { %868 = vst.msk [vmem:[#allocation13] sm:$0xff] %vm596_vm5, %v866_v16 }
 0x916   :  { %v831_v18 = vpop.xlane.xlu1 %830 }
 0x917   :  { %v833_v19 = vmul.f32 %v831_v18, %v1431_v0 }
 0x919   :  { %v835_v20 = vadd.f32 1e-05, %v833_v19 }
 0x91b   :  { %1019 = vrsqrt.f32 %v835_v20  ;;  %vm852_vm1 = vweird.f32 %v835_v20 }
 0x921   :  { %v1020_v22 = vpop.eup %1019 }
 0x922   :  { %v847_v23 = vmul.f32 %v1020_v22, %v835_v20  ;;  %vm853_vm0 = vweird.f32 %v1020_v22 }
 0x923   :  { %vm854_vm2 = vmor %vm852_vm1, %vm853_vm0 }
 0x924   :  { %v848_v24 = vmul.f32 %v1020_v22, %v847_v23 }
 0x926   :  { %v849_v25 = vmul.f32 0.5, %v848_v24 }
 0x928   :  { %v850_v26 = vsub.f32 1.5, %v849_v25 }
 0x92a   :  { %v851_v27 = vmul.f32 %v1020_v22, %v850_v26 }
 0x92c   :  { %v855_v28 = vsel %vm854_vm2, %v1020_v22, %v851_v27 }
 0x92d   :  { %v857_v29 = vmul.f32 %v855_v28, %v823_v59 }
 0x92f   :  { %v862_v0 = vmul.f32 %v993_v10, %v857_v29 }
 0x931   :  { %v867_v30 = vadd.f32 %v994_v12, %v862_v0 }
 0x933   :  { %869 = vst.msk [vmem:[#allocation13 + $0x8] sm:$0xff] %vm596_vm5, %v867_v30 }
 0x934   :  { %882 = dma.vmem_to_hbm [thread:$0]  %s875_s17, 256, %s877_s2, [#allocation6], %s1190_s24, %s1190_s24, %s1184_s1  }
 0x935   :  { %1171 = dma.done.wait [#allocation6], 256  }
 0x936   :  { %1172 = vsyncadd [#allocation6], 4294967040 }
 0x937   :  { %887 = vsyncpa [#allocation5], 1 }
 0x938   :  { %888 = vsyncpa [#allocation8], 1 }
 0x939   :  { %889 = vsyncpa [#allocation11], 1 }
 0x93a   :  { %890 = vsyncpa [#allocation6], 1 }

</bundles_post_ra>
